<compile_context>
chip_gen: v5e
topology: v5e:2x2
jax: 0.10.0
libtpu: 0.0.40
codegen_flags: <defaults>
</compile_context>

<pallas_src>
import inspect

import jax
import jax.numpy as jnp
from jax import lax
from jax.experimental import pallas as pl
from jax.experimental.pallas import tpu as pltpu

LN_EPS = 1e-5          # PyTorch nn.LayerNorm default
FF_CHUNK = 512         # max F-chunk of the FFN weights consumed per inner step


def _layer_norm(h, gamma, beta):
    # Biased variance, like PyTorch LayerNorm. All in f32.
    mu = jnp.mean(h, axis=-1, keepdims=True)
    var = jnp.mean((h - mu) ** 2, axis=-1, keepdims=True)
    return (h - mu) * lax.rsqrt(var + LN_EPS) * gamma + beta


def _ffn_chunk(F):
    """Largest chunk of the FFN hidden dim (<= FF_CHUNK) that divides F."""
    if F <= FF_CHUNK:
        return F
    c = FF_CHUNK
    while F % c != 0:
        c //= 2
    return c


def transformer_layer_kernel(
    x_ref,     # (S, D)  f32   full sequence for the current batch row
    wq_ref,    # (D, D)  bf16
    wkv_ref,   # (D, 2D) bf16  [Wk | Wv] fused
    wo_ref,    # (D, D)  bf16
    w1_ref,    # (D, F)  bf16
    w2_ref,    # (F, D)  bf16
    ln_ref,    # (4, D)  f32   rows: g1, b1, g2, b2
    o_ref,     # (TQ, D) f32
    kv_ref,    # (S, 2D) bf16  scratch: [K | V], persists across query tiles
):
    qi = pl.program_id(1)
    S, D = x_ref.shape
    TQ = o_ref.shape[0]

    # --- K/V projection: once per batch row (q-tile grid axis is "arbitrary",
    #     so this scratch survives across the remaining query tiles) ---
    @pl.when(qi == 0)
    def _():
        xkv_b = x_ref[...].astype(jnp.bfloat16)                       # (S, D)
        kv = jnp.dot(xkv_b, wkv_ref[...],
                     preferred_element_type=jnp.float32)              # (S, 2D)
        kv_ref[...] = kv.astype(jnp.bfloat16)

    # --- query tile sliced out of the resident full-sequence block ---
    row0 = pl.multiple_of(qi * TQ, TQ)
    xq = x_ref[pl.ds(row0, TQ), :]                                    # (TQ, D) f32
    xq_b = xq.astype(jnp.bfloat16)

    q = jnp.dot(xq_b, wq_ref[...], preferred_element_type=jnp.float32)
    # Fold 1/sqrt(d_model) into q, then immediately drop to bf16.
    q = (q * jnp.float32(D ** -0.5)).astype(jnp.bfloat16)             # (TQ, D)

    k = kv_ref[:, :D]                                                 # (S, D) bf16
    v = kv_ref[:, D:]                                                 # (S, D) bf16

    # scores: contract the D axis of q and k directly (no explicit k.T).
    scores = lax.dot_general(
        q, k, dimension_numbers=(((1,), (1,)), ((), ())),
        preferred_element_type=jnp.float32)                           # (TQ, S)

    # --- stable softmax in f32; EUP reciprocal + one Newton step (~exact) ---
    scores = scores - jnp.max(scores, axis=-1, keepdims=True)
    e = jnp.exp(scores)
    denom = jnp.sum(e, axis=-1, keepdims=True)
    r = pl.reciprocal(denom, approx=True)
    r = r * (2.0 - denom * r)                  # Newton refinement -> ~f32 exact
    attn = (e * r).astype(jnp.bfloat16)

    ctx = jnp.dot(attn, v,
                  preferred_element_type=jnp.float32).astype(jnp.bfloat16)
    o = jnp.dot(ctx, wo_ref[...], preferred_element_type=jnp.float32)  # (TQ, D)

    # --- residual + LayerNorm 1 (f32) ---
    ln = ln_ref[...]                           # (4, D) f32, read once
    g1, b1 = ln[0:1, :], ln[1:2, :]
    g2, b2 = ln[2:3, :], ln[3:4, :]
    h = _layer_norm(xq + o, g1, b1)            # (TQ, D) f32

    # --- feed-forward, chunked over the F axis, f32 accumulation ---
    h_b = h.astype(jnp.bfloat16)               # hoisted: reused for every chunk
    F = w1_ref.shape[1]
    f_chunk = _ffn_chunk(F)
    n_chunks = F // f_chunk

    def ff_step(c, acc):
        start = pl.multiple_of(c * f_chunk, f_chunk)
        w1_c = w1_ref[:, pl.ds(start, f_chunk)]          # (D, f_chunk) bf16
        w2_c = w2_ref[pl.ds(start, f_chunk), :]          # (f_chunk, D) bf16
        a1 = jnp.dot(h_b, w1_c, preferred_element_type=jnp.float32)
        a1 = jnp.maximum(a1, 0.0).astype(jnp.bfloat16)
        return acc + jnp.dot(a1, w2_c, preferred_element_type=jnp.float32)

    if n_chunks == 1:
        ff = ff_step(0, jnp.zeros_like(h))
    else:
        ff = lax.fori_loop(0, n_chunks, ff_step, jnp.zeros_like(h), unroll=True)

    # --- residual + LayerNorm 2 (f32) ---
    y = _layer_norm(h + ff, g2, b2)
    o_ref[...] = y.astype(o_ref.dtype)


def _supports_single_buffering():
    """Feature-detect BlockSpec(pipeline_mode=...) without swallowing real errors."""
    if not hasattr(pl, "Buffered"):
        return False
    try:
        return "pipeline_mode" in inspect.signature(pl.BlockSpec).parameters
    except (TypeError, ValueError):
        return False


def _vmem_limit_bytes():
    """Generation-dependent VMEM budget: ~3/4 of physical per-TensorCore VMEM.

    v5e/v6e (128 MiB) -> ~96 MiB; v7x (64 MiB) -> ~48 MiB. Introspection only;
    falls back to a conservative limit if the query is unavailable.
    """
    try:
        cap = int(getattr(pltpu.get_tpu_info(), "vmem_capacity_bytes", 0))
    except Exception:
        cap = 0
    if cap <= 0:
        cap = 64 * 1024 * 1024
    return (cap * 3) // 4


def transformer_layer(x, params, *, tq=128):
    """x: (B, S, D) float32. params: see init_params (bf16 weights, f32 LN)."""
    B, S, D = x.shape
    F = params["w1"].shape[1]
    assert D % 128 == 0, "d_model must be a multiple of 128 (lane-dense)"
    tq = min(tq, S)
    assert S % tq == 0 and (tq % 8 == 0 or tq == S)
    n_q = S // tq

    single_buffer = _supports_single_buffering()

    def wspec(shape):
        idx = lambda b, qi: (0,) * len(shape)
        if single_buffer:
            # Constant-index blocks: one VMEM buffer suffices (halves weight
            # residency -- important for v7x's 64 MiB VMEM).
            return pl.BlockSpec(shape, idx, pipeline_mode=pl.Buffered(1))
        return pl.BlockSpec(shape, idx)

    return pl.pallas_call(
        transformer_layer_kernel,
        out_shape=jax.ShapeDtypeStruct((B, S, D), x.dtype),
        grid=(B, n_q),
        in_specs=[
            # Full sequence for batch b; constant index over the q-tile axis so
            # it is only re-DMA'd when the batch row changes.
            pl.BlockSpec((None, S, D), lambda b, qi: (b, 0, 0)),
            wspec((D, D)),        # wq
            wspec((D, 2 * D)),    # wkv = [wk | wv]
            wspec((D, D)),        # wo
            wspec((D, F)),        # ff1
            wspec((F, D)),        # ff2
            wspec((4, D)),        # LayerNorm params packed
        ],
        out_specs=pl.BlockSpec((None, tq, D), lambda b, qi: (b, qi, 0)),
        scratch_shapes=[pltpu.VMEM((S, 2 * D), jnp.bfloat16)],
        compiler_params=pltpu.CompilerParams(
            dimension_semantics=("parallel", "arbitrary"),
            vmem_limit_bytes=_vmem_limit_bytes(),
        ),
    )(x, params["wq"], params["wkv"], params["wo"],
      params["w1"], params["w2"], params["ln"])


def init_params(key, d_model, d_ff):
    ks = jax.random.split(key, 6)
    scale = 0.02

    def w(k, shape):
        return (scale * jax.random.normal(k, shape, jnp.float32)).astype(jnp.bfloat16)

    ones = jnp.ones((d_model,), jnp.float32)
    zeros = jnp.zeros((d_model,), jnp.float32)
    wk = w(ks[1], (d_model, d_model))
    wv = w(ks[2], (d_model, d_model))
    return {
        "wq": w(ks[0], (d_model, d_model)),
        "wkv": jnp.concatenate([wk, wv], axis=1),   # fused K/V projection weight
        "wo": w(ks[3], (d_model, d_model)),
        "w1": w(ks[4], (d_model, d_ff)),
        "w2": w(ks[5], (d_ff, d_model)),
        # LayerNorm defaults (weight=1, bias=0) packed as rows [g1, b1, g2, b2].
        "ln": jnp.stack([ones, zeros, ones, zeros], axis=0),
    }


def reference_forward(x, p):
    """Pure-JAX f32 reference mirroring the PyTorch forward."""
    d = x.shape[-1]
    wq = p["wq"].astype(jnp.float32)
    wkv = p["wkv"].astype(jnp.float32)
    wk, wv = wkv[:, :d], wkv[:, d:]
    wo = p["wo"].astype(jnp.float32)
    w1 = p["w1"].astype(jnp.float32)
    w2 = p["w2"].astype(jnp.float32)
    g1, b1, g2, b2 = p["ln"][0], p["ln"][1], p["ln"][2], p["ln"][3]

    q = x @ wq
    k = x @ wk
    v = x @ wv
    attn = jax.nn.softmax((q @ jnp.swapaxes(k, -2, -1)) / d ** 0.5, axis=-1)
    ctx = attn @ v
    h = x + ctx @ wo
    mu = h.mean(-1, keepdims=True)
    var = ((h - mu) ** 2).mean(-1, keepdims=True)
    h = (h - mu) / jnp.sqrt(var + LN_EPS) * g1 + b1
    ff = jnp.maximum(h @ w1, 0.0) @ w2
    y = h + ff
    mu2 = y.mean(-1, keepdims=True)
    var2 = ((y - mu2) ** 2).mean(-1, keepdims=True)
    return (y - mu2) / jnp.sqrt(var2 + LN_EPS) * g2 + b2


if __name__ == "__main__":
    # Small but lane-dense shapes: D, F multiples of 128; S multiple of 16.
    B, S, D, F = 2, 64, 128, 256

    key = jax.random.PRNGKey(0)
    kx, kp = jax.random.split(key)
    x = jax.random.normal(kx, (B, S, D), jnp.float32)
    params = init_params(kp, D, F)

    out = transformer_layer(x, params)      # tq=128 clamps to S=64 here
    out = jax.block_until_ready(out)

    ref = reference_forward(x, params)
    assert out.shape == (B, S, D)
    # bf16 MXU operands are the dominant error source -> loose tolerance.
    assert jnp.allclose(out, ref, atol=5e-2, rtol=5e-2), "mismatch vs reference"

    print("KERNEL_OK")
</pallas_src>

<mosaic_0001>
module attributes {stable_mosaic.version = 11 : i64} {
  func.func @transformer_layer_kernel(%arg0: i32, %arg1: i32, %arg2: memref<1x64x128xf32, #tpu.memory_space<vmem>>, %arg3: memref<128x128xbf16, #tpu.memory_space<vmem>>, %arg4: memref<128x256xbf16, #tpu.memory_space<vmem>>, %arg5: memref<128x128xbf16, #tpu.memory_space<vmem>>, %arg6: memref<128x256xbf16, #tpu.memory_space<vmem>>, %arg7: memref<256x128xbf16, #tpu.memory_space<vmem>>, %arg8: memref<4x128xf32, #tpu.memory_space<vmem>>, %arg9: memref<1x64x128xf32, #tpu.memory_space<vmem>>, %arg10: memref<64x256xbf16, #tpu.memory_space<vmem>>) attributes {dimension_semantics = [#tpu.dimension_semantics<parallel>, #tpu.dimension_semantics<arbitrary>], iteration_bounds = array<i64: 2, 1>, scalar_prefetch = 0 : i64, scratch_operands = 1 : i64, tpu.core_type = #tpu.core_type<tc>, window_params = [{transform_indices = @transform_0, window_bounds = array<i64: 1, 64, 128>}, {pipeline_mode = #tpu.pipeline_mode<synchronous>, transform_indices = @transform_1, window_bounds = array<i64: 128, 128>}, {pipeline_mode = #tpu.pipeline_mode<synchronous>, transform_indices = @transform_2, window_bounds = array<i64: 128, 256>}, {pipeline_mode = #tpu.pipeline_mode<synchronous>, transform_indices = @transform_3, window_bounds = array<i64: 128, 128>}, {pipeline_mode = #tpu.pipeline_mode<synchronous>, transform_indices = @transform_4, window_bounds = array<i64: 128, 256>}, {pipeline_mode = #tpu.pipeline_mode<synchronous>, transform_indices = @transform_5, window_bounds = array<i64: 256, 128>}, {pipeline_mode = #tpu.pipeline_mode<synchronous>, transform_indices = @transform_6, window_bounds = array<i64: 4, 128>}, {transform_indices = @transform_7, window_bounds = array<i64: 1, 64, 128>}]} {
    %c0_i32 = arith.constant 0 : i32
    %0 = arith.cmpi eq, %arg1, %c0_i32 : i32
    %1 = arith.extui %0 : i1 to i32
    %c0_i32_0 = arith.constant 0 : i32
    %2 = arith.cmpi ne, %1, %c0_i32_0 : i32
    scf.if %2 {
      %c0_38 = arith.constant 0 : index
      %c0_39 = arith.constant 0 : index
      %c0_40 = arith.constant 0 : index
      %103 = vector.load %arg2[%c0_38, %c0_39, %c0_40] : memref<1x64x128xf32, #tpu.memory_space<vmem>>, vector<1x64x128xf32>
      %104 = vector.shape_cast %103 : vector<1x64x128xf32> to vector<64x128xf32>
      %105 = arith.truncf %104 : vector<64x128xf32> to vector<64x128xbf16>
      %c0_41 = arith.constant 0 : index
      %c0_42 = arith.constant 0 : index
      %106 = vector.load %arg4[%c0_41, %c0_42] : memref<128x256xbf16, #tpu.memory_space<vmem>>, vector<128x256xbf16>
      %cst_43 = arith.constant dense<0.000000e+00> : vector<64x256xf32>
      %107 = tpu.matmul %105, %106, %cst_43 {dimension_numbers = #tpu.dot_dimension_numbers<[1], [0], [0], [1], [0, 0, 1, 1], [], []>} : vector<64x128xbf16>, vector<128x256xbf16>, vector<64x256xf32> -> vector<64x256xf32>
      %108 = arith.truncf %107 : vector<64x256xf32> to vector<64x256xbf16>
      %c0_44 = arith.constant 0 : index
      %c0_45 = arith.constant 0 : index
      %109 = vector.load %arg10[%c0_44, %c0_45] : memref<64x256xbf16, #tpu.memory_space<vmem>>, vector<64x256xbf16>
      tpu.vector_store %arg10[%c0_44, %c0_45], %108 {strides = array<i32>} : memref<64x256xbf16, #tpu.memory_space<vmem>>, vector<64x256xbf16>,
    } else {
    }
    %c64_i32 = arith.constant 64 : i32
    %3 = arith.muli %arg1, %c64_i32 : i32
    %4 = tpu.assume_multiple %3, 64 : i32
    %c0 = arith.constant 0 : index
    %5 = arith.index_cast %4 : i32 to index
    %c0_1 = arith.constant 0 : index
    %6 = vector.load %arg2[%c0, %5, %c0_1] : memref<1x64x128xf32, #tpu.memory_space<vmem>>, vector<1x64x128xf32>
    %7 = vector.shape_cast %6 : vector<1x64x128xf32> to vector<64x128xf32>
    %8 = arith.truncf %7 : vector<64x128xf32> to vector<64x128xbf16>
    %c0_2 = arith.constant 0 : index
    %c0_3 = arith.constant 0 : index
    %9 = vector.load %arg3[%c0_2, %c0_3] : memref<128x128xbf16, #tpu.memory_space<vmem>>, vector<128x128xbf16>
    %cst = arith.constant dense<0.000000e+00> : vector<64x128xf32>
    %10 = tpu.matmul %8, %9, %cst {dimension_numbers = #tpu.dot_dimension_numbers<[1], [0], [0], [1], [0, 0, 1, 1], [], []>} : vector<64x128xbf16>, vector<128x128xbf16>, vector<64x128xf32> -> vector<64x128xf32>
    %cst_4 = arith.constant 0.0883883461 : f32
    %11 = vector.broadcast %cst_4 : f32 to vector<64x128xf32>
    %12 = arith.mulf %10, %11 : vector<64x128xf32>
    %13 = arith.truncf %12 : vector<64x128xf32> to vector<64x128xbf16>
    %c0_5 = arith.constant 0 : index
    %c0_6 = arith.constant 0 : index
    %14 = vector.load %arg10[%c0_5, %c0_6] : memref<64x256xbf16, #tpu.memory_space<vmem>>, vector<64x128xbf16>
    %c0_7 = arith.constant 0 : index
    %c128 = arith.constant 128 : index
    %15 = vector.load %arg10[%c0_7, %c128] : memref<64x256xbf16, #tpu.memory_space<vmem>>, vector<64x128xbf16>
    %cst_8 = arith.constant dense<0.000000e+00> : vector<64x64xf32>
    %16 = tpu.matmul %13, %14, %cst_8 {dimension_numbers = #tpu.dot_dimension_numbers<[1], [1], [0], [0], [0, 0, 1, 0], [], []>} : vector<64x128xbf16>, vector<64x128xbf16>, vector<64x64xf32> -> vector<64x64xf32>
    %cst_9 = arith.constant dense<0xFF800000> : vector<64xf32>
    %17 = vector.multi_reduction <maximumf>, %16, %cst_9 [1] : vector<64x64xf32> to vector<64xf32>
    %18 = vector.shape_cast %17 : vector<64xf32> to vector<64x1xf32>
    %19 = vector.broadcast %18 : vector<64x1xf32> to vector<64x64xf32>
    %20 = arith.subf %16, %19 : vector<64x64xf32>
    %21 = math.exp %20 : vector<64x64xf32>
    %cst_10 = arith.constant dense<0.000000e+00> : vector<64xf32>
    %22 = vector.multi_reduction <add>, %21, %cst_10 [1] : vector<64x64xf32> to vector<64xf32>
    %23 = vector.shape_cast %22 : vector<64xf32> to vector<64x1xf32>
    %24 = tpu.reciprocal %23 {approx = true} : vector<64x1xf32> -> vector<64x1xf32>
    %25 = arith.mulf %23, %24 : vector<64x1xf32>
    %cst_11 = arith.constant 2.000000e+00 : f32
    %26 = vector.broadcast %cst_11 : f32 to vector<64x1xf32>
    %27 = arith.subf %26, %25 : vector<64x1xf32>
    %28 = arith.mulf %24, %27 : vector<64x1xf32>
    %29 = vector.broadcast %28 : vector<64x1xf32> to vector<64x64xf32>
    %30 = arith.mulf %21, %29 : vector<64x64xf32>
    %31 = arith.truncf %30 : vector<64x64xf32> to vector<64x64xbf16>
    %cst_12 = arith.constant dense<0.000000e+00> : vector<64x128xf32>
    %32 = tpu.matmul %31, %15, %cst_12 {dimension_numbers = #tpu.dot_dimension_numbers<[1], [0], [0], [1], [0, 0, 1, 1], [], []>} : vector<64x64xbf16>, vector<64x128xbf16>, vector<64x128xf32> -> vector<64x128xf32>
    %33 = arith.truncf %32 : vector<64x128xf32> to vector<64x128xbf16>
    %c0_13 = arith.constant 0 : index
    %c0_14 = arith.constant 0 : index
    %34 = vector.load %arg5[%c0_13, %c0_14] : memref<128x128xbf16, #tpu.memory_space<vmem>>, vector<128x128xbf16>
    %cst_15 = arith.constant dense<0.000000e+00> : vector<64x128xf32>
    %35 = tpu.matmul %33, %34, %cst_15 {dimension_numbers = #tpu.dot_dimension_numbers<[1], [0], [0], [1], [0, 0, 1, 1], [], []>} : vector<64x128xbf16>, vector<128x128xbf16>, vector<64x128xf32> -> vector<64x128xf32>
    %c0_16 = arith.constant 0 : index
    %c0_17 = arith.constant 0 : index
    %36 = vector.load %arg8[%c0_16, %c0_17] : memref<4x128xf32, #tpu.memory_space<vmem>>, vector<4x128xf32>
    %37 = vector.extract_strided_slice %36 {offsets = [0, 0], sizes = [1, 128], strides = [1, 1]} : vector<4x128xf32> to vector<1x128xf32>
    %38 = vector.extract_strided_slice %36 {offsets = [1, 0], sizes = [1, 128], strides = [1, 1]} : vector<4x128xf32> to vector<1x128xf32>
    %39 = vector.extract_strided_slice %36 {offsets = [2, 0], sizes = [1, 128], strides = [1, 1]} : vector<4x128xf32> to vector<1x128xf32>
    %40 = vector.extract_strided_slice %36 {offsets = [3, 0], sizes = [1, 128], strides = [1, 1]} : vector<4x128xf32> to vector<1x128xf32>
    %41 = arith.addf %7, %35 : vector<64x128xf32>
    %cst_18 = arith.constant dense<0.000000e+00> : vector<64xf32>
    %42 = vector.multi_reduction <add>, %41, %cst_18 [1] : vector<64x128xf32> to vector<64xf32>
    %43 = vector.shape_cast %42 : vector<64xf32> to vector<64x1xf32>
    %cst_19 = arith.constant 1.280000e+02 : f32
    %44 = vector.broadcast %cst_19 : f32 to vector<64x1xf32>
    %45 = arith.divf %43, %44 : vector<64x1xf32>
    %46 = vector.broadcast %45 : vector<64x1xf32> to vector<64x128xf32>
    %47 = arith.subf %41, %46 : vector<64x128xf32>
    %48 = arith.mulf %47, %47 : vector<64x128xf32>
    %cst_20 = arith.constant dense<0.000000e+00> : vector<64xf32>
    %49 = vector.multi_reduction <add>, %48, %cst_20 [1] : vector<64x128xf32> to vector<64xf32>
    %50 = vector.shape_cast %49 : vector<64xf32> to vector<64x1xf32>
    %cst_21 = arith.constant 1.280000e+02 : f32
    %51 = vector.broadcast %cst_21 : f32 to vector<64x1xf32>
    %52 = arith.divf %50, %51 : vector<64x1xf32>
    %53 = vector.broadcast %45 : vector<64x1xf32> to vector<64x128xf32>
    %54 = arith.subf %41, %53 : vector<64x128xf32>
    %cst_22 = arith.constant 9.99999974E-6 : f32
    %55 = vector.broadcast %cst_22 : f32 to vector<64x1xf32>
    %56 = arith.addf %52, %55 : vector<64x1xf32>
    %57 = math.rsqrt %56 : vector<64x1xf32>
    %58 = vector.broadcast %57 : vector<64x1xf32> to vector<64x128xf32>
    %59 = arith.mulf %54, %58 : vector<64x128xf32>
    %60 = vector.broadcast %37 : vector<1x128xf32> to vector<64x128xf32>
    %61 = arith.mulf %59, %60 : vector<64x128xf32>
    %62 = vector.broadcast %38 : vector<1x128xf32> to vector<64x128xf32>
    %63 = arith.addf %61, %62 : vector<64x128xf32>
    %64 = arith.truncf %63 : vector<64x128xf32> to vector<64x128xbf16>
    %cst_23 = arith.constant 0.000000e+00 : f32
    %65 = vector.broadcast %cst_23 : f32 to vector<64x128xf32>
    %c0_i32_24 = arith.constant 0 : i32
    %66 = tpu.assume_multiple %c0_i32_24, 256 : i32
    %c0_25 = arith.constant 0 : index
    %67 = arith.index_cast %66 : i32 to index
    %68 = vector.load %arg6[%c0_25, %67] : memref<128x256xbf16, #tpu.memory_space<vmem>>, vector<128x256xbf16>
    %69 = arith.index_cast %66 : i32 to index
    %c0_26 = arith.constant 0 : index
    %70 = vector.load %arg7[%69, %c0_26] : memref<256x128xbf16, #tpu.memory_space<vmem>>, vector<256x128xbf16>
    %cst_27 = arith.constant dense<0.000000e+00> : vector<64x256xf32>
    %71 = tpu.matmul %64, %68, %cst_27 {dimension_numbers = #tpu.dot_dimension_numbers<[1], [0], [0], [1], [0, 0, 1, 1], [], []>} : vector<64x128xbf16>, vector<128x256xbf16>, vector<64x256xf32> -> vector<64x256xf32>
    %cst_28 = arith.constant 0.000000e+00 : f32
    %72 = vector.broadcast %cst_28 : f32 to vector<64x256xf32>
    %73 = arith.maximumf %71, %72 : vector<64x256xf32>
    %74 = arith.truncf %73 : vector<64x256xf32> to vector<64x256xbf16>
    %cst_29 = arith.constant dense<0.000000e+00> : vector<64x128xf32>
    %75 = tpu.matmul %74, %70, %cst_29 {dimension_numbers = #tpu.dot_dimension_numbers<[1], [0], [0], [1], [0, 0, 1, 1], [], []>} : vector<64x256xbf16>, vector<256x128xbf16>, vector<64x128xf32> -> vector<64x128xf32>
    %76 = arith.addf %65, %75 : vector<64x128xf32>
    %77 = arith.addf %63, %76 : vector<64x128xf32>
    %cst_30 = arith.constant dense<0.000000e+00> : vector<64xf32>
    %78 = vector.multi_reduction <add>, %77, %cst_30 [1] : vector<64x128xf32> to vector<64xf32>
    %79 = vector.shape_cast %78 : vector<64xf32> to vector<64x1xf32>
    %cst_31 = arith.constant 1.280000e+02 : f32
    %80 = vector.broadcast %cst_31 : f32 to vector<64x1xf32>
    %81 = arith.divf %79, %80 : vector<64x1xf32>
    %82 = vector.broadcast %81 : vector<64x1xf32> to vector<64x128xf32>
    %83 = arith.subf %77, %82 : vector<64x128xf32>
    %84 = arith.mulf %83, %83 : vector<64x128xf32>
    %cst_32 = arith.constant dense<0.000000e+00> : vector<64xf32>
    %85 = vector.multi_reduction <add>, %84, %cst_32 [1] : vector<64x128xf32> to vector<64xf32>
    %86 = vector.shape_cast %85 : vector<64xf32> to vector<64x1xf32>
    %cst_33 = arith.constant 1.280000e+02 : f32
    %87 = vector.broadcast %cst_33 : f32 to vector<64x1xf32>
    %88 = arith.divf %86, %87 : vector<64x1xf32>
    %89 = vector.broadcast %81 : vector<64x1xf32> to vector<64x128xf32>
    %90 = arith.subf %77, %89 : vector<64x128xf32>
    %cst_34 = arith.constant 9.99999974E-6 : f32
    %91 = vector.broadcast %cst_34 : f32 to vector<64x1xf32>
    %92 = arith.addf %88, %91 : vector<64x1xf32>
    %93 = math.rsqrt %92 : vector<64x1xf32>
    %94 = vector.broadcast %93 : vector<64x1xf32> to vector<64x128xf32>
    %95 = arith.mulf %90, %94 : vector<64x128xf32>
    %96 = vector.broadcast %39 : vector<1x128xf32> to vector<64x128xf32>
    %97 = arith.mulf %95, %96 : vector<64x128xf32>
    %98 = vector.broadcast %40 : vector<1x128xf32> to vector<64x128xf32>
    %99 = arith.addf %97, %98 : vector<64x128xf32>
    %c0_35 = arith.constant 0 : index
    %c0_36 = arith.constant 0 : index
    %c0_37 = arith.constant 0 : index
    %100 = vector.load %arg9[%c0_35, %c0_36, %c0_37] : memref<1x64x128xf32, #tpu.memory_space<vmem>>, vector<1x64x128xf32>
    %101 = vector.shape_cast %100 : vector<1x64x128xf32> to vector<64x128xf32>
    %102 = vector.shape_cast %99 : vector<64x128xf32> to vector<1x64x128xf32>
    tpu.vector_store %arg9[%c0_35, %c0_36, %c0_37], %102 {strides = array<i32>} : memref<1x64x128xf32, #tpu.memory_space<vmem>>, vector<1x64x128xf32>,
    return
  }
  func.func @transform_0(%arg0: i32, %arg1: i32) -> (i32, i32, i32) {
    %c0_i32 = arith.constant 0 : i32
    %c0_i32_0 = arith.constant 0 : i32
    %c0_i32_1 = arith.constant 0 : i32
    return %arg0, %c0_i32, %c0_i32_0 : i32, i32, i32
  }
  func.func @transform_1(%arg0: i32, %arg1: i32) -> (i32, i32) {
    %c0_i32 = arith.constant 0 : i32
    %c0_i32_0 = arith.constant 0 : i32
    %c0_i32_1 = arith.constant 0 : i32
    return %c0_i32, %c0_i32_0 : i32, i32
  }
  func.func @transform_2(%arg0: i32, %arg1: i32) -> (i32, i32) {
    %c0_i32 = arith.constant 0 : i32
    %c0_i32_0 = arith.constant 0 : i32
    %c0_i32_1 = arith.constant 0 : i32
    return %c0_i32, %c0_i32_0 : i32, i32
  }
  func.func @transform_3(%arg0: i32, %arg1: i32) -> (i32, i32) {
    %c0_i32 = arith.constant 0 : i32
    %c0_i32_0 = arith.constant 0 : i32
    %c0_i32_1 = arith.constant 0 : i32
    return %c0_i32, %c0_i32_0 : i32, i32
  }
  func.func @transform_4(%arg0: i32, %arg1: i32) -> (i32, i32) {
    %c0_i32 = arith.constant 0 : i32
    %c0_i32_0 = arith.constant 0 : i32
    %c0_i32_1 = arith.constant 0 : i32
    return %c0_i32, %c0_i32_0 : i32, i32
  }
  func.func @transform_5(%arg0: i32, %arg1: i32) -> (i32, i32) {
    %c0_i32 = arith.constant 0 : i32
    %c0_i32_0 = arith.constant 0 : i32
    %c0_i32_1 = arith.constant 0 : i32
    return %c0_i32, %c0_i32_0 : i32, i32
  }
  func.func @transform_6(%arg0: i32, %arg1: i32) -> (i32, i32) {
    %c0_i32 = arith.constant 0 : i32
    %c0_i32_0 = arith.constant 0 : i32
    %c0_i32_1 = arith.constant 0 : i32
    return %c0_i32, %c0_i32_0 : i32, i32
  }
  func.func @transform_7(%arg0: i32, %arg1: i32) -> (i32, i32, i32) {
    %c0_i32 = arith.constant 0 : i32
    %c0_i32_0 = arith.constant 0 : i32
    return %arg0, %arg1, %c0_i32 : i32, i32, i32
  }
}

</mosaic_0001>

<bundles_post_ra>
// kernel: tpu_custom_call.1
= control target key start
LH: loop header
LB: loop body
LE: loop exit
PB: predicated region body
PF: predicated region fallthrough
CT: control target
= control target key end

     0   :  { %s3370_s0 = inlined_call_operand.hbm [shape: f32[2,64,128], index: 0, kind: input, shape index: {}]   ;;  %s3371_s1 = inlined_call_operand.hbm [shape: bf16[128,128], index: 1, kind: input, shape index: {}]   ;;  %s3372_s2 = inlined_call_operand.hbm [shape: bf16[128,256], index: 2, kind: input, shape index: {}]   ;;  %s3373_s3 = inlined_call_operand.hbm [shape: bf16[128,128], index: 3, kind: input, shape index: {}]   ;;  %s3374_s4 = inlined_call_operand.hbm [shape: bf16[128,256], index: 4, kind: input, shape index: {}]   ;;  %s3375_s5 = inlined_call_operand.hbm [shape: bf16[256,128], index: 5, kind: input, shape index: {}]   ;;  %s3376_s6 = inlined_call_operand.vmem [shape: f32[4,128], index: 6, kind: input, shape index: {}]   ;;  %s3377_s7 = inlined_call_operand.hbm [shape: f32[2,64,128], index: 7, kind: output, shape index: {}]  }
   0x1   :  { %3381 = sst [smem:[#allocation20_spill]] %s3371_s1 }
   0x2   :  { %3382 = sst [smem:[#allocation21_spill]] %s3372_s2 }
   0x3   :  { %3383 = sst [smem:[#allocation22_spill]] %s3373_s3 }
   0x4   :  { %3384 = sst [smem:[#allocation23_spill]] %s3374_s4 }
   0x5   :  { %12 = vsyncpa [#allocation4], 0 }
   0x6   :  { %14 = vsyncpa [#allocation4 + $0x1], 0 }
   0x7   :  { %15 = vsyncpa [#allocation7], 0 }
   0x8   :  { %16 = vsyncpa [#allocation10], 0 }
   0x9   :  { %17 = vsyncpa [#allocation13], 0 }
   0xa   :  { %18 = vsyncpa [#allocation5], 0 }
   0xb   :  { %20 = vsyncpa [#allocation5 + $0x1], 0  ;;  %s2880_s24 = smov 0   ;;  %s2882_s25 = smov 0  }
   0xc   :  { %s2884_s26 = smov 0   ;;  %s2886_s27 = smov 0  }
   0xd   :  { %s2888_s28 = smov 0   ;;  %s2890_s29 = smov 0  }
   0xe LB: > { %s3378_s30 = sadd.s32 4294967295, %s2826_s29   ;;  %p1961_p0 = scmp.ge.s32.totalorder %s2826_s29, 1  ;;  %s2826_s29 = sphi %s2890_s29, %s26_s29   ;;  %s2822_s28 = sphi %s2888_s28, %s3403_s28   ;;  %s2818_s27 = sphi %s2886_s27, %s3402_s27   ;;  %s2814_s26 = sphi %s2884_s26, %s3401_s26   ;;  %s2810_s25 = sphi %s2882_s25, %s3400_s25   ;;  %s2806_s24 = sphi %s2880_s24, %s3399_s24  }
   0xf   : > { %p2914_p1 = scmp.eq.s32.totalorder %s3378_s30, 0  ;;  %p223_p2 = scmp.lt.s32.totalorder %s2826_s29, 3 }
  0x10   : > { %s3386_s1 = sld [smem:[#allocation20_spill]]  ;;  %s2828_s13 = smov [#allocation6]  }
  0x11   : > { %p2922_p3 = pnand %p1961_p0, %p223_p2  ;;  %s236_s14 = sshll.u32 %s2828_s13, 4  ;;  %s237_s14 = int_to_ptr.vmem [resolvable:$true] %s236_s14 }
  0x12   : > { %p1967_p6 = scmp.ge.s32.totalorder %s2826_s29, 2  ;;  %s3389_s3 = sld [smem:[#allocation22_spill]] }
  0x13   : > { %p2390_p4 = pneg %p2922_p3  ;;  %s2829_s19 = smov 64  }
  0x14   : > { %s2830_s20 = smov 4   ;;  %s2831_s21 = smov [#allocation9]  }
  0x15   : > { %p2930_p5 = pnand %p2390_p4, %p2914_p1  ;;  %s264_s22 = sshll.u32 %s2831_s21, 4  ;;  %s265_s22 = int_to_ptr.vmem [resolvable:$true] %s264_s22 }
  0x16   : > { %s234_s11 = sshll.u32 %s3386_s1, 4  ;;  %s3390_s2 = sld [smem:[#allocation21_spill]]  ;;  %s235_s11 = int_to_ptr.hbm [resolvable:$true] %s234_s11 }
  0x17   : > { %2393 = dma.hbm_to_vmem [thread:$0]  (!%p2930_p5), %s235_s11, 1024, %s237_s14, [#allocation7], %s2829_s19, %s2829_s19, %s2830_s20  }
  0x18   : > { %s262_s18 = sshll.u32 %s3389_s3, 4  ;;  %s2832_s13 = smov [#allocation8]   ;;  %s263_s18 = int_to_ptr.hbm [resolvable:$true] %s262_s18 }
  0x19   : > { %2399 = dma.hbm_to_vmem [thread:$0]  (!%p2930_p5), %s263_s18, 1024, %s265_s22, [#allocation10], %s2829_s19, %s2829_s19, %s2830_s20  }
  0x1a   : > { %s250_s16 = sshll.u32 %s2832_s13, 4  ;;  %s3391_s4 = sld [smem:[#allocation23_spill]]  ;;  %s251_s16 = int_to_ptr.vmem [resolvable:$true] %s250_s16 }
  0x1b   : > { %s3379_s14 = smov 128   ;;  %s3380_s21 = smov 8  }
  0x1c   : > { %s248_s10 = sshll.u32 %s3390_s2, 4  ;;  %s2835_s18 = smov [#allocation11]   ;;  %s249_s10 = int_to_ptr.hbm [resolvable:$true] %s248_s10 }
  0x1d   : > { %2396 = dma.hbm_to_vmem [thread:$0]  (!%p2930_p5), %s249_s10, 2048, %s251_s16, [#allocation7], %s3379_s14, %s3379_s14, %s3380_s21  }
  0x1e   : > { %s278_s22 = sshll.u32 %s2835_s18, 4  ;;  %s290_s9 = sshll.u32 %s3375_s5, 4  ;;  %s279_s22 = int_to_ptr.vmem [resolvable:$true] %s278_s22  ;;  %s291_s9 = int_to_ptr.hbm [resolvable:$true] %s290_s9 }
  0x1f   : > { %s2836_s10 = smov [#allocation12]   ;;  %s1960_s16 = sadd.s32 4294967294, %s2826_s29  }
  0x20   : > { %s276_s11 = sshll.u32 %s3391_s4, 4  ;;  %s292_s13 = sshll.u32 %s2836_s10, 4  ;;  %s277_s11 = int_to_ptr.hbm [resolvable:$true] %s276_s11  ;;  %s293_s13 = int_to_ptr.vmem [resolvable:$true] %s292_s13 }
  0x21   : > { %2402 = dma.hbm_to_vmem [thread:$0]  (!%p2930_p5), %s277_s11, 2048, %s279_s22, [#allocation10], %s3379_s14, %s3379_s14, %s3380_s21  }
  0x22   : > { %2405 = dma.hbm_to_vmem [thread:$0]  (!%p2930_p5), %s291_s9, 2048, %s293_s13, [#allocation13], %s2829_s19, %s2829_s19, %s2830_s20  }
  0x23   : > { %s38_s17 = sadd.s32 1, %s2822_s28  ;;  %s45_s18 = sadd.s32 1, %s2814_s26 }
  0x24   : > { %p40_p7 = scmp.ge.s32.totalorder %s38_s17, 2  ;;  %p52_p8 = scmp.ne.s32.totalorder %s2814_s26, %s2810_s25 }
  0x25   : > { %p53_p9 = scmp.eq.s32.totalorder %s2826_s29, 0  ;;  %p58_p10 = scmp.ne.s32.totalorder %s2810_s25, %s2806_s24 }
  0x26   : > { %s3405_s17 = smov (%p40_p7, %s38_s17), 0  ;;  %s3394_s20 = sadd.s32 4294967295, %s2826_s29  }
  0x27   : > { %p2973_p11 = por %p53_p9, %p52_p8  ;;  %p2979_p12 = por %p2914_p1, %p58_p10 }
  0x28   : > { %s42_s19 = ssub.s32 %s2822_s28, %s3405_s17  ;;  %p210_p13 = scmp.eq.s32.totalorder %s3394_s20, 1 }
  0x29   : > { %p43_p0 = scmp.eq.s32.totalorder %s42_s19, 0  ;;  %p216_p2 = scmp.eq.s32.totalorder %s1960_s16, 1 }
  0x2a   : > { %p2987_p4 = por %p210_p13, %p52_p8  ;;  %p2419_p5 = scmp.lt.s32.totalorder %s2826_s29, 2 }
  0x2b   : > { %s2993_s30 = scalar_select %p43_p0, %s2814_s26, %s45_s18  }
  0x2c   : > { %p2995_p7 = por %p216_p2, %p58_p10  ;;  %s309_s9 = sand.u32 1, %s2814_s26  }
  0x2d   : > { %s1968_s10 = sshll.u32 %s309_s9, 6  ;;  %s2276_s13 = sshll.u32 %s2822_s28, 6 }
  0x2e   : > { %s318_s20 = scalar_lea.hbm %s3370_s0, %s2276_s13  ;;  %s313_s19 = scalar_lea.vmem [#allocation3], %s1968_s10 }
  0x2f   : > { %s321_s16 = sshll.u32 %s313_s19, 4  ;;  %s319_s1 = sshll.u32 %s318_s20, 4  ;;  %s322_s16 = int_to_ptr.vmem [resolvable:$true] %s321_s16  ;;  %s320_s1 = int_to_ptr.hbm [resolvable:$true] %s319_s1 }
  0x30   : > { %p2407_p8 = pnand %p2419_p5, %p2973_p11  ;;  %s310_s18 = scalar_lea.sflag [#allocation4], %s309_s9 }
  0x31   : > { %s3397_s2 = smov 8   ;;  %s3398_s3 = smov 128  }
  0x32   : > { %2409 = dma.hbm_to_vmem [thread:$0]  (!%p2407_p8), %s320_s1, 1024, %s322_s16, %s310_s18, %s3398_s3, %s3398_s3, %s3397_s2  }
  0x33   : > { %333 = sbr.rel (%p2922_p3) target bundleno = 1913 (0x779), region = 48  ;;  %s3012_s4 = sand.u32 (!%p2922_p3), 1, %s2810_s25  }
  0x34   : > { %s1972_s14 = sshll.u32 (!%p2922_p3), %s3012_s4, 6  ;;  %s336_s21 = scalar_lea.sflag (!%p2922_p3), [#allocation4], %s3012_s4 }
  0x35   : > { %s3018_s11 = scalar_lea.vmem (!%p2922_p3), [#allocation3], %s1972_s14 }
  0x38   : > { %2785 = dma.done.wait (%p2979_p12), %s336_s21, 1024  }
  0x39   : > { %2787 = vsyncadd (%p2979_p12), %s336_s21, 4294966272 }
  0x3a   : > { %2789 = dma.done.wait (%p2914_p1), [#allocation7], 3072  }
  0x3b   : > { %2791 = vsyncadd (%p2914_p1), [#allocation7], 4294964224 }
  0x3c   : > { %2793 = dma.done.wait (%p2914_p1), [#allocation10], 3072  }
  0x3d   : > { %2795 = vsyncadd (%p2914_p1), [#allocation10], 4294964224 }
  0x3e   : > { %2797 = dma.done.wait (%p2914_p1), [#allocation13], 2048  }
  0x3f   : > { %2799 = vsyncadd (%p2914_p1), [#allocation13], 4294965248  ;;  %v2037_v0 = vld [vmem:[#allocation8 + $0x70] sm:$0xf]  ;;  %v2292_v1 = vld [vmem:[#allocation8 + $0x74] sm:$0xf0] }
  0x40   : > { %v2291_v2 = vld [vmem:[#allocation8 + $0x74] sm:$0xf]  ;;  %v2038_v3 = vor.u32 %v2292_v1, %v2037_v0  ;;  %v2039_v4 = vld [vmem:[#allocation8 + $0x78] sm:$0xf0]  ;;  %v2029_v5 = vld [vmem:[#allocation8 + $0x60] sm:$0xf] }
  0x41   : > { %v2290_v6 = vld [vmem:[#allocation8 + $0x64] sm:$0xf0]  ;;  %v2042_v7 = vor.u32 %v2291_v2, %v2039_v4  ;;  %v2289_v8 = vld [vmem:[#allocation8 + $0x64] sm:$0xf]  ;;  %v2031_v9 = vld [vmem:[#allocation8 + $0x68] sm:$0xf0] }
  0x42   : > { %2350 = vmatpush.bf16.msra.mxu2 %v2038_v3  ;;  %v2030_v10 = vor.u32 %v2290_v6, %v2029_v5  ;;  %510 = vmatpush.bf16.msra.mxu0 %v2038_v3  ;;  %v2034_v11 = vor.u32 %v2289_v8, %v2031_v9  ;;  %v2021_v12 = vld [vmem:[#allocation8 + $0x50] sm:$0xf]  ;;  %v2288_v13 = vld [vmem:[#allocation8 + $0x54] sm:$0xf0]  ;;  %v2287_v14 = vld [vmem:[#allocation8 + $0x54] sm:$0xf] }
  0x43   : > { %2358 = vmatpush.bf16.msra.mxu3 %v2042_v7  ;;  %539 = vmatpush.bf16.msra.mxu1 %v2042_v7  ;;  %v2023_v15 = vld [vmem:[#allocation8 + $0x58] sm:$0xf0]  ;;  %v2022_v16 = vor.u32 %v2288_v13, %v2021_v12  ;;  %v2013_v18 = vld [vmem:[#allocation8 + $0x40] sm:$0xf]  ;;  %v2286_v19 = vld [vmem:[#allocation8 + $0x44] sm:$0xf0] }
  0x44   : > { %v2026_v17 = vor.u32 %v2287_v14, %v2023_v15  ;;  %v2285_v20 = vld [vmem:[#allocation8 + $0x44] sm:$0xf]  ;;  %v2015_v21 = vld [vmem:[#allocation8 + $0x48] sm:$0xf0]  ;;  %v2014_v22 = vor.u32 %v2286_v19, %v2013_v18  ;;  %v2005_v24 = vld [vmem:[#allocation8 + $0x30] sm:$0xf] }
  0x45   : > { %v2018_v23 = vor.u32 %v2285_v20, %v2015_v21  ;;  %v2284_v25 = vld [vmem:[#allocation8 + $0x34] sm:$0xf0]  ;;  %v2283_v26 = vld [vmem:[#allocation8 + $0x34] sm:$0xf]  ;;  %v2007_v27 = vld [vmem:[#allocation8 + $0x38] sm:$0xf0] }
  0x46   : > { %2351 = vmatpush.bf16.msra.mxu2 %v2030_v10  ;;  %511 = vmatpush.bf16.msra.mxu0 %v2030_v10  ;;  %v2006_v28 = vor.u32 %v2284_v25, %v2005_v24  ;;  %v2010_v29 = vor.u32 %v2283_v26, %v2007_v27  ;;  %v1997_v30 = vld [vmem:[#allocation8 + $0x20] sm:$0xf]  ;;  %v2282_v31 = vld [vmem:[#allocation8 + $0x24] sm:$0xf0]  ;;  %v2281_v32 = vld [vmem:[#allocation8 + $0x24] sm:$0xf] }
  0x47   : > { %2359 = vmatpush.bf16.msra.mxu3 %v2034_v11  ;;  %540 = vmatpush.bf16.msra.mxu1 %v2034_v11  ;;  %v1999_v33 = vld [vmem:[#allocation8 + $0x28] sm:$0xf0]  ;;  %v1998_v34 = vor.u32 %v2282_v31, %v1997_v30  ;;  %v1989_v36 = vld [vmem:[#allocation8 + $0x10] sm:$0xf]  ;;  %v2280_v37 = vld [vmem:[#allocation8 + $0x14] sm:$0xf0] }
  0x48   : > { %v2002_v35 = vor.u32 %v2281_v32, %v1999_v33  ;;  %v2279_v38 = vld [vmem:[#allocation8 + $0x14] sm:$0xf]  ;;  %v1991_v39 = vld [vmem:[#allocation8 + $0x18] sm:$0xf0]  ;;  %v1990_v40 = vor.u32 %v2280_v37, %v1989_v36  ;;  %v1981_v42 = vld [vmem:[#allocation8] sm:$0xf] }
  0x49   : > { %v1994_v41 = vor.u32 %v2279_v38, %v1991_v39  ;;  %v2278_v43 = vld [vmem:[#allocation8 + $0x4] sm:$0xf0]  ;;  %v2277_v44 = vld [vmem:[#allocation8 + $0x4] sm:$0xf]  ;;  %v1983_v45 = vld [vmem:[#allocation8 + $0x8] sm:$0xf0] }
  0x4a   : > { %2352 = vmatpush.bf16.msra.mxu2 %v2022_v16  ;;  %512 = vmatpush.bf16.msra.mxu0 %v2022_v16  ;;  %v3037_v46 = vld [vmem:[%s3018_s11 + $0x20] sm:$0xff]  ;;  %v1982_v47 = vor.u32 %v2278_v43, %v1981_v42  ;;  %v3040_v48 = vld [vmem:[%s3018_s11 + $0x28] sm:$0xff]  ;;  %v1986_v51 = vor.u32 %v2277_v44, %v1983_v45  ;;  %v2300_v52 = vld [vmem:[#allocation6 + $0x38] sm:$0xff]  ;;  %vm772_vm0 = vcmask 523264   ;;  %s3296_s3 = scalar_lea.vmem [#allocation14], %s1972_s14  ;;  %s2349_s8 = sshll.u32 %s2818_s27, 6 }
  0x4b   : > { %2360 = vmatpush.bf16.msra.mxu3 %v2026_v17  ;;  %541 = vmatpush.bf16.msra.mxu1 %v2026_v17  ;;  %v3043_v49 = vld [vmem:[%s3018_s11] sm:$0xff]  ;;  %v3046_v50 = vld [vmem:[%s3018_s11 + $0x8] sm:$0xff]  ;;  %v412_v53 = vpack.c.bf16 %v3040_v48, %v3037_v46  ;;  %v2299_v55 = vld [vmem:[#allocation6 + $0x30] sm:$0xff]  ;;  %s1821_s9 = scalar_lea.hbm %s3377_s7, %s2349_s8  ;;  %s1822_s10 = sshll.u32 %s3296_s3, 4  ;;  %s1823_s10 = int_to_ptr.vmem [resolvable:$true] %s1822_s10 }
  0x4c   : > { %v410_v54 = vpack.c.bf16 %v3046_v50, %v3043_v49  ;;  %v2298_v56 = vld [vmem:[#allocation6 + $0x28] sm:$0xff]  ;;  %v2297_v57 = vld [vmem:[#allocation6 + $0x20] sm:$0xff]  ;;  %v3053_v58 = vld [vmem:[%s3018_s11 + $0x30] sm:$0xff]  ;;  %s1824_s27 = sshll.u32 %s1821_s9, 4  ;;  %s1808_s13 = scalar_lea.sflag [#allocation5], %s3012_s4  ;;  %s1825_s27 = int_to_ptr.hbm [resolvable:$true] %s1824_s27 }
  0x4d   : > { %v3056_v59 = vld [vmem:[%s3018_s11 + $0x38] sm:$0xff]  ;;  %v3059_v60 = vld [vmem:[%s3018_s11 + $0x10] sm:$0xff]  ;;  %v2294_v2 = vld [vmem:[#allocation6 + $0x8] sm:$0xff]  ;;  %s2746_s20 = sshra.s32 %s1825_s27, 4  ;;  %s2752_s14 = scalar_lea.hbm %s3377_s7, 128  ;;  %s2747_s20 = int_to_ptr.hbm [resolvable:$true] %s2746_s20 }
  0x4e   : > { %2353 = vmatpush.bf16.msra.mxu2 %v2014_v22  ;;  %513 = vmatpush.bf16.msra.mxu0 %v2014_v22  ;;  %v3062_v61 = vld [vmem:[%s3018_s11 + $0x18] sm:$0xff]  ;;  %v413_v63 = vpack.c.bf16 %v3056_v59, %v3053_v58  ;;  %v2295_v1 = vld [vmem:[#allocation6 + $0x10] sm:$0xff]  ;;  %v2293_v3 = vld [vmem:[#allocation6] sm:$0xff]  ;;  %s2748_s19 = scalar_lea.hbm %s2747_s20, 64  ;;  %p2753_p10 = scmp.lt.s32.totalorder %s2747_s20, %s3377_s7 }
  0x4f   : > { %2361 = vmatpush.bf16.msra.mxu3 %v2018_v23  ;;  %542 = vmatpush.bf16.msra.mxu1 %v2018_v23  ;;  %v2296_v62 = vld [vmem:[#allocation6 + $0x18] sm:$0xff]  ;;  %v411_v0 = vpack.c.bf16 %v3062_v61, %v3059_v60  ;;  %p2749_p1 = scmp.ne.s32.totalorder %s2747_s20, %s2748_s19  ;;  %p2754_p11 = scmp.lt.s32.totalorder %s2752_s14, %s2748_s19 }
  0x51   : > { %p2750_p3 = pnand %p2749_p1, %p2987_p4  ;;  %p2755_p12 = por %p2754_p11, %p2753_p10 }
  0x52   : > { %2354 = vmatpush.bf16.msra.mxu2 %v2006_v28  ;;  %514 = vmatpush.bf16.msra.mxu0 %v2006_v28 }
  0x53   : > { %2362 = vmatpush.bf16.msra.mxu3 %v2010_v29  ;;  %543 = vmatpush.bf16.msra.mxu1 %v2010_v29  ;;  %p2751_p9 = pneg %p2750_p3 }
  0x55   : > { %p2756_p13 = pnand %p2755_p12, %p2751_p9 }
  0x56   : > { %2355 = vmatpush.bf16.msra.mxu2 %v1998_v34  ;;  %515 = vmatpush.bf16.msra.mxu0 %v1998_v34 }
  0x57   : > { %2363 = vmatpush.bf16.msra.mxu3 %v2002_v35  ;;  %544 = vmatpush.bf16.msra.mxu1 %v2002_v35 }
  0x5a   : > { %2356 = vmatpush.bf16.msra.mxu2 %v1990_v40  ;;  %516 = vmatpush.bf16.msra.mxu0 %v1990_v40 }
  0x5b   : > { %2364 = vmatpush.bf16.msra.mxu3 %v1994_v41  ;;  %545 = vmatpush.bf16.msra.mxu1 %v1994_v41 }
  0x5e   : > { %2357 = vmatpush.bf16.msra.mxu2 %v1982_v47  ;;  %517 = vmatpush.bf16.msra.mxu0 %v1982_v47 }
  0x5f   : > { %2365 = vmatpush.bf16.msra.mxu3 %v1986_v51  ;;  %546 = vmatpush.bf16.msra.mxu1 %v1986_v51 }
  0x61   : > { %528 = vmatmul.bf16.vlgmr.msra.gmra.mxu2 %v412_v53  ;;  %518 = vmatmul.bf16.vlgmr.msra.gmra.mxu0 %v410_v54 }
  0x62   : > { %662 = vmatpush.bf16.msrb.mxu2 %v2300_v52  ;;  %557 = vmatmul.bf16.vlgmr.msra.gmra.mxu3 %v412_v53 }
  0x63   : > { %547 = vmatmul.bf16.vlgmr.msra.gmra.mxu1 %v410_v54 }
  0x66   : > { %663 = vmatpush.bf16.msrb.mxu2 %v2299_v55 }
  0x6a   : > { %664 = vmatpush.bf16.msrb.mxu2 %v2298_v56 }
  0x6e   : > { %665 = vmatpush.bf16.msrb.mxu2 %v2297_v57 }
  0x71   : > { %533 = vmatmul.bf16.gmra.mxu2 %v413_v63  ;;  %523 = vmatmul.bf16.gmra.mxu0 %v411_v0 }
  0x72   : > { %666 = vmatpush.bf16.msrb.mxu2 %v2296_v62  ;;  %562 = vmatmul.bf16.gmra.mxu3 %v413_v63 }
  0x73   : > { %552 = vmatmul.bf16.gmra.mxu1 %v411_v0 }
  0x76   : > { %667 = vmatpush.bf16.msrb.mxu2 %v2295_v1 }
  0x7a   : > { %668 = vmatpush.bf16.msrb.mxu2 %v2294_v2 }
  0x7e   : > { %669 = vmatpush.bf16.msrb.mxu2 %v2293_v3 }
  0x81   : > { %670 = vmatmul.bf16.vlgmr.msrb.gmra.mxu2 %v410_v54 }
  0x91   : > { %675 = vmatmul.bf16.gmra.mxu2 %v411_v0 }
  0xa1   : > { %680 = vmatmul.bf16.gmra.mxu2 %v412_v53 }
  0xb1   : > { %685 = vmatmul.bf16.gmra.mxu2 %v413_v63 }
  0xde   : > { %v519_v4 = vpop.f32.mrf.mxu0 }
  0xe0   : > { %v548_v5 = vpop.f32.mrf.mxu1 }
  0xe1   : > { %v568_v6 = vpack.c.bf16 %v548_v5, %v519_v4 }
  0xe3   : > { %576 = vst [vmem:[#allocation2] sm:$0xff] %v568_v6 }
  0xe4   : > { %v529_v7 = vpop.f32.mrf.mxu2 }
  0xe5   : > { %v558_v8 = vpop.f32.mrf.mxu3 }
  0xe6   : > { %v572_v9 = vpack.c.bf16 %v558_v8, %v529_v7  ;;  %v521_v10 = vpop.f32.mrf.mxu0 }
  0xe8   : > { %v550_v11 = vpop.f32.mrf.mxu1  ;;  %580 = vst [vmem:[#allocation2 + $0x20] sm:$0xff] %v572_v9 }
  0xe9   : > { %v569_v12 = vpack.c.bf16 %v550_v11, %v521_v10 }
  0xea   : > { %v2093_v44 = vld [vmem:[#allocation2 + $0x4] sm:$0xf]  ;;  %v2077_v56 = vld [vmem:[#allocation2] sm:$0xf] }
  0xeb   : > { %577 = vst [vmem:[#allocation2 + $0x8] sm:$0xff] %v569_v12 }
  0xec   : > { %v531_v13 = vpop.f32.mrf.mxu2 }
  0xed   : > { %v560_v14 = vpop.f32.mrf.mxu3 }
  0xee   : > { %v573_v15 = vpack.c.bf16 %v560_v14, %v531_v13  ;;  %v524_v16 = vpop.f32.mrf.mxu0 }
  0xef   : > { %v2101_v36 = vld [vmem:[#allocation2 + $0x24] sm:$0xf]  ;;  %v2085_v42 = vld [vmem:[#allocation2 + $0x20] sm:$0xf] }
  0xf0   : > { %v553_v17 = vpop.f32.mrf.mxu1  ;;  %581 = vst [vmem:[#allocation2 + $0x28] sm:$0xff] %v573_v15 }
  0xf1   : > { %v570_v18 = vpack.c.bf16 %v553_v17, %v524_v16 }
  0xf2   : > { %v2305_v45 = vld [vmem:[#allocation2 + $0x8] sm:$0xf0]  ;;  %v2301_v57 = vld [vmem:[#allocation2 + $0x4] sm:$0xf0] }
  0xf3   : > { %578 = vst [vmem:[#allocation2 + $0x10] sm:$0xff] %v570_v18  ;;  %v2094_v47 = vor.u32 %v2305_v45, %v2093_v44  ;;  %v2078_v62 = vor.u32 %v2301_v57, %v2077_v56 }
  0xf4   : > { %v534_v19 = vpop.f32.mrf.mxu2 }
  0xf5   : > { %v563_v20 = vpop.f32.mrf.mxu3 }
  0xf6   : > { %v574_v21 = vpack.c.bf16 %v563_v20, %v534_v19  ;;  %v526_v22 = vpop.f32.mrf.mxu0 }
  0xf7   : > { %v2307_v34 = vld [vmem:[#allocation2 + $0x28] sm:$0xf0]  ;;  %v2303_v40 = vld [vmem:[#allocation2 + $0x24] sm:$0xf0] }
  0xf8   : > { %v555_v23 = vpop.f32.mrf.mxu1  ;;  %582 = vst [vmem:[#allocation2 + $0x30] sm:$0xff] %v574_v21  ;;  %v2102_v39 = vor.u32 %v2307_v34, %v2101_v36  ;;  %v2086_v43 = vor.u32 %v2303_v40, %v2085_v42 }
  0xf9   : > { %v571_v24 = vpack.c.bf16 %v555_v23, %v526_v22 }
  0xfa   : > { %v2097_v37 = vld [vmem:[#allocation2 + $0x14] sm:$0xf]  ;;  %v2081_v52 = vld [vmem:[#allocation2 + $0x10] sm:$0xf] }
  0xfb   : > { %579 = vst [vmem:[#allocation2 + $0x18] sm:$0xff] %v571_v24 }
  0xfc   : > { %v536_v25 = vpop.f32.mrf.mxu2 }
  0xfd   : > { %v565_v26 = vpop.f32.mrf.mxu3 }
  0xfe   : > { %v575_v27 = vpack.c.bf16 %v565_v26, %v536_v25 }
  0xff   : > { %v2089_v28 = vld [vmem:[#allocation2 + $0x30] sm:$0xf]  ;;  %v2105_v30 = vld [vmem:[#allocation2 + $0x34] sm:$0xf] }
 0x100   : > { %583 = vst [vmem:[#allocation2 + $0x38] sm:$0xff] %v575_v27 }
 0x102   : > { %v2306_v38 = vld [vmem:[#allocation2 + $0x18] sm:$0xf0]  ;;  %v2302_v53 = vld [vmem:[#allocation2 + $0x14] sm:$0xf0] }
 0x103   : > { %v2098_v41 = vor.u32 %v2306_v38, %v2097_v37  ;;  %v2082_v54 = vor.u32 %v2302_v53, %v2081_v52 }
 0x104   : > { %v671_v35 = vpop.f32.mrf.mxu2 }
 0x105   : > { %v691_v63 = vmul.f32 0.088388346, %v671_v35 }
 0x107   : > { %v2304_v29 = vld [vmem:[#allocation2 + $0x34] sm:$0xf0]  ;;  %v2308_v31 = vld [vmem:[#allocation2 + $0x38] sm:$0xf0] }
 0x108   : > { %v2090_v32 = vor.u32 %v2304_v29, %v2089_v28  ;;  %v2106_v33 = vor.u32 %v2308_v31, %v2105_v30 }
 0x10a   : > { %747 = vmatpush.bf16.xpose.msrb.mxu3 %v2090_v32  ;;  %929 = vmatpush.bf16.msrb.mxu0 %v2106_v33 }
 0x10c   : > { %v673_v51 = vpop.f32.mrf.mxu2 }
 0x10d   : > { %v692_v0 = vmul.f32 0.088388346, %v673_v51 }
 0x10e   : > { %930 = vmatpush.bf16.msrb.mxu0 %v2102_v39 }
 0x10f   : > { %v699_v2 = vpack.c.bf16 %v692_v0, %v691_v63 }
 0x112   : > { %748 = vmatpush.bf16.xpose.msrb.mxu3 %v2086_v43  ;;  %931 = vmatpush.bf16.msrb.mxu0 %v2098_v41 }
 0x114   : > { %v676_v55 = vpop.f32.mrf.mxu2 }
 0x115   : > { %v693_v4 = vmul.f32 0.088388346, %v676_v55 }
 0x116   : > { %932 = vmatpush.bf16.msrb.mxu0 %v2094_v47 }
 0x11a   : > { %749 = vmatpush.bf16.xpose.msrb.mxu3 %v2082_v54 }
 0x11c   : > { %v678_v1 = vpop.f32.mrf.mxu2 }
 0x11d   : > { %v694_v5 = vmul.f32 0.088388346, %v678_v1 }
 0x11f   : > { %v700_v6 = vpack.c.bf16 %v694_v5, %v693_v4 }
 0x122   : > { %750 = vmatpush.bf16.xpose.msrb.mxu3 %v2078_v62 }
 0x124   : > { %v681_v3 = vpop.f32.mrf.mxu2 }
 0x125   : > { %v695_v8 = vmul.f32 0.088388346, %v681_v3 }
 0x129   : > { %751 = vmatmul.bf16.vlgmr.msrb.gmra.mxu3 %v699_v2 }
 0x12c   : > { %v683_v7 = vpop.f32.mrf.mxu2 }
 0x12d   : > { %v696_v9 = vmul.f32 0.088388346, %v683_v7 }
 0x12f   : > { %v701_v11 = vpack.c.bf16 %v696_v9, %v695_v8 }
 0x134   : > { %v686_v10 = vpop.f32.mrf.mxu2 }
 0x135   : > { %v697_v13 = vmul.f32 0.088388346, %v686_v10 }
 0x139   : > { %756 = vmatmul.bf16.gmra.mxu3 %v700_v6 }
 0x13c   : > { %v688_v12 = vpop.f32.mrf.mxu2 }
 0x13d   : > { %v698_v14 = vmul.f32 0.088388346, %v688_v12 }
 0x13f   : > { %v702_v15 = vpack.c.bf16 %v698_v14, %v697_v13 }
 0x149   : > { %761 = vmatmul.bf16.gmra.mxu3 %v701_v11 }
 0x159   : > { %766 = vmatmul.bf16.gmra.mxu3 %v702_v15 }
 0x1ac   : > { %v752_v16 = vpop.f32.mrf.mxu3 }
 0x1ad   : > { %v773_v17 = vsel %vm772_vm0, %v752_v16, -inf }
 0x1ae   : > { %774 = vmax.xlane.f32.xlu0 %v773_v17 }
 0x1b4   : > { %v754_v18 = vpop.f32.mrf.mxu3 }
 0x1b5   : > { %v776_v19 = vsel %vm772_vm0, %v754_v18, -inf }
 0x1b6   : > { %777 = vmax.xlane.f32.xlu0 %v776_v19 }
 0x1bc   : > { %v757_v20 = vpop.f32.mrf.mxu3 }
 0x1bd   : > { %v779_v21 = vsel %vm772_vm0, %v757_v20, -inf }
 0x1be   : > { %780 = vmax.xlane.f32.xlu1 %v779_v21 }
 0x1c4   : > { %v759_v22 = vpop.f32.mrf.mxu3 }
 0x1c5   : > { %v782_v23 = vsel %vm772_vm0, %v759_v22, -inf }
 0x1c6   : > { %783 = vmax.xlane.f32.xlu1 %v782_v23 }
 0x1cc   : > { %v762_v24 = vpop.f32.mrf.mxu3 }
 0x1cd   : > { %v785_v25 = vsel %vm772_vm0, %v762_v24, -inf }
 0x1ce   : > { %786 = vmax.xlane.f32.xlu2 %v785_v25 }
 0x1d4   : > { %v764_v26 = vpop.f32.mrf.mxu3 }
 0x1d5   : > { %v788_v27 = vsel %vm772_vm0, %v764_v26, -inf }
 0x1d6   : > { %789 = vmax.xlane.f32.xlu2 %v788_v27 }
 0x1dc   : > { %v767_v28 = vpop.f32.mrf.mxu3 }
 0x1dd   : > { %v791_v29 = vsel %vm772_vm0, %v767_v28, -inf }
 0x1de   : > { %792 = vmax.xlane.f32.xlu0 %v791_v29 }
 0x1e4   : > { %v769_v30 = vpop.f32.mrf.mxu3 }
 0x1e5   : > { %v794_v31 = vsel %vm772_vm0, %v769_v30, -inf }
 0x1e6   : > { %795 = vmax.xlane.f32.xlu1 %v794_v31 }
 0x221   : > { %v775_v32 = vpop.xlane.xlu0 %774 }
 0x222   : > { %v797_v33 = vsub.f32 %v752_v16, %v775_v32 }
 0x224   : > { %v805_v34 = vmul.f32 1.442695, %v797_v33 }
 0x226   : > { %2486 = vpow2.f32 %v805_v34 }
 0x229   : > { %v778_v35 = vpop.xlane.xlu0 %777 }
 0x22a   : > { %v798_v36 = vsub.f32 %v754_v18, %v778_v35 }
 0x22c   : > { %v3076_v37 = vpop.eup %2486  ;;  %v807_v38 = vmul.f32 1.442695, %v798_v36 }
 0x22d   : > { %v821_v39 = vsel %vm772_vm0, %v3076_v37, 0.0 }
 0x22e   : > { %2488 = vpow2.f32 %v807_v38  ;;  %822 = vadd.xlane.f32.xlu2 %v821_v39 }
 0x231   : > { %v781_v40 = vpop.xlane.xlu1 %780 }
 0x232   : > { %v799_v41 = vsub.f32 %v757_v20, %v781_v40 }
 0x234   : > { %v2489_v42 = vpop.eup %2488  ;;  %v809_v43 = vmul.f32 1.442695, %v799_v41 }
 0x235   : > { %v824_v44 = vsel %vm772_vm0, %v2489_v42, 0.0 }
 0x236   : > { %2490 = vpow2.f32 %v809_v43  ;;  %825 = vadd.xlane.f32.xlu0 %v824_v44 }
 0x239   : > { %v784_v45 = vpop.xlane.xlu1 %783 }
 0x23a   : > { %v800_v47 = vsub.f32 %v759_v22, %v784_v45 }
 0x23c   : > { %v3081_v51 = vpop.eup %2490  ;;  %v811_v52 = vmul.f32 1.442695, %v800_v47  ;;  %v2316_v47 = vld [vmem:[#allocation9 + $0x38] sm:$0xff] }
 0x23d   : > { %v827_v53 = vsel %vm772_vm0, %v3081_v51, 0.0  ;;  %1022 = vmatpush.bf16.msrb.mxu1 %v2316_v47 }
 0x23e   : > { %2492 = vpow2.f32 %v811_v52  ;;  %828 = vadd.xlane.f32.xlu1 %v827_v53  ;;  %v2315_v52 = vld [vmem:[#allocation9 + $0x30] sm:$0xff] }
 0x241   : > { %v787_v54 = vpop.xlane.xlu2 %786  ;;  %1023 = vmatpush.bf16.msrb.mxu1 %v2315_v52 }
 0x242   : > { %v801_v55 = vsub.f32 %v762_v24, %v787_v54 }
 0x244   : > { %v2493_v56 = vpop.eup %2492  ;;  %v813_v57 = vmul.f32 1.442695, %v801_v55 }
 0x245   : > { %v830_v62 = vsel %vm772_vm0, %v2493_v56, 0.0 }
 0x246   : > { %2494 = vpow2.f32 %v813_v57  ;;  %831 = vadd.xlane.f32.xlu2 %v830_v62  ;;  %v2314_v62 = vld [vmem:[#allocation9 + $0x28] sm:$0xff] }
 0x247   : > { %1024 = vmatpush.bf16.msrb.mxu1 %v2314_v62 }
 0x249   : > { %v790_v63 = vpop.xlane.xlu2 %789 }
 0x24a   : > { %v802_v0 = vsub.f32 %v764_v26, %v790_v63 }
 0x24c   : > { %v3086_v1 = vpop.eup %2494  ;;  %v815_v2 = vmul.f32 1.442695, %v802_v0  ;;  %v2313_v0 = vld [vmem:[#allocation9 + $0x20] sm:$0xff] }
 0x24d   : > { %v833_v3 = vsel %vm772_vm0, %v3086_v1, 0.0  ;;  %1025 = vmatpush.bf16.msrb.mxu1 %v2313_v0 }
 0x24e   : > { %2496 = vpow2.f32 %v815_v2  ;;  %834 = vadd.xlane.f32.xlu0 %v833_v3 }
 0x251   : > { %v793_v4 = vpop.xlane.xlu0 %792 }
 0x252   : > { %v803_v5 = vsub.f32 %v767_v28, %v793_v4 }
 0x254   : > { %v3090_v6 = vpop.eup %2496  ;;  %v817_v7 = vmul.f32 1.442695, %v803_v5 }
 0x255   : > { %v836_v8 = vsel %vm772_vm0, %v3090_v6, 0.0 }
 0x256   : > { %2498 = vpow2.f32 %v817_v7  ;;  %837 = vadd.xlane.f32.xlu1 %v836_v8  ;;  %v2312_v8 = vld [vmem:[#allocation9 + $0x18] sm:$0xff] }
 0x257   : > { %1026 = vmatpush.bf16.msrb.mxu1 %v2312_v8 }
 0x259   : > { %v796_v9 = vpop.xlane.xlu1 %795 }
 0x25a   : > { %v804_v10 = vsub.f32 %v769_v30, %v796_v9 }
 0x25c   : > { %v3094_v11 = vpop.eup %2498  ;;  %v819_v12 = vmul.f32 1.442695, %v804_v10 }
 0x25d   : > { %v839_v13 = vsel %vm772_vm0, %v3094_v11, 0.0 }
 0x25e   : > { %2500 = vpow2.f32 %v819_v12  ;;  %840 = vadd.xlane.f32.xlu2 %v839_v13 }
 0x264   : > { %v3098_v14 = vpop.eup %2500 }
 0x265   : > { %v842_v15 = vsel %vm772_vm0, %v3098_v14, 0.0 }
 0x266   : > { %843 = vadd.xlane.f32.xlu0 %v842_v15 }
 0x2a1   : > { %v823_v16 = vpop.xlane.xlu2 %822 }
 0x2a2   : > { %2502 = vrcp.f32 %v823_v16 }
 0x2a8   : > { %v2503_v17 = vpop.eup %2502 }
 0x2a9   : > { %v826_v18 = vpop.xlane.xlu0 %825  ;;  %v853_v19 = vmul.f32 %v2503_v17, %v823_v16 }
 0x2aa   : > { %2504 = vrcp.f32 %v826_v18 }
 0x2ab   : > { %v861_v20 = vsub.f32 2.0, %v853_v19  ;;  %v2311_v19 = vld [vmem:[#allocation9 + $0x10] sm:$0xff] }
 0x2ac   : > { %1027 = vmatpush.bf16.msrb.mxu1 %v2311_v19 }
 0x2ad   : > { %v869_v24 = vmul.f32 %v2503_v17, %v861_v20  ;;  %v2310_v20 = vld [vmem:[#allocation9 + $0x8] sm:$0xff] }
 0x2af   : > { %v877_v27 = vmul.f32 %v3076_v37, %v869_v24 }
 0x2b0   : > { %v2505_v21 = vpop.eup %2504  ;;  %1028 = vmatpush.bf16.msrb.mxu1 %v2310_v20 }
 0x2b1   : > { %v854_v22 = vmul.f32 %v2505_v21, %v826_v18  ;;  %v829_v23 = vpop.xlane.xlu1 %828 }
 0x2b2   : > { %2506 = vrcp.f32 %v829_v23 }
 0x2b3   : > { %v862_v25 = vsub.f32 2.0, %v854_v22 }
 0x2b5   : > { %v870_v26 = vmul.f32 %v2505_v21, %v862_v25  ;;  %v2309_v21 = vld [vmem:[#allocation9] sm:$0xff] }
 0x2b6   : > { %1029 = vmatpush.bf16.msrb.mxu1 %v2309_v21  ;;  %v2201_v21 = vld [vmem:[#allocation11 + $0x70] sm:$0xf] }
 0x2b7   : > { %v878_v28 = vmul.f32 %v2489_v42, %v870_v26 }
 0x2b8   : > { %v2507_v29 = vpop.eup %2506 }
 0x2b9   : > { %v832_v30 = vpop.xlane.xlu2 %831  ;;  %v885_v31 = vpack.c.bf16 %v878_v28, %v877_v27  ;;  %v855_v32 = vmul.f32 %v2507_v29, %v829_v23 }
 0x2ba   : > { %2508 = vrcp.f32 %v832_v30 }
 0x2bb   : > { %2107 = vmatmul.msk.bf16.vlgmr.msrb.gmra.mxu0 %vm772_vm0, %v885_v31  ;;  %v863_v33 = vsub.f32 2.0, %v855_v32 }
 0x2bd   : > { %v871_v38 = vmul.f32 %v2507_v29, %v863_v33 }
 0x2bf   : > { %v879_v41 = vmul.f32 %v3081_v51, %v871_v38 }
 0x2c0   : > { %v2509_v34 = vpop.eup %2508 }
 0x2c1   : > { %v856_v35 = vmul.f32 %v2509_v34, %v832_v30  ;;  %v835_v36 = vpop.xlane.xlu0 %834 }
 0x2c2   : > { %2510 = vrcp.f32 %v835_v36 }
 0x2c3   : > { %v864_v39 = vsub.f32 2.0, %v856_v35 }
 0x2c5   : > { %v872_v40 = vmul.f32 %v2509_v34, %v864_v39 }
 0x2c7   : > { %v880_v43 = vmul.f32 %v2493_v56, %v872_v40 }
 0x2c8   : > { %v2511_v37 = vpop.eup %2510 }
 0x2c9   : > { %v838_v42 = vpop.xlane.xlu1 %837  ;;  %v886_v44 = vpack.c.bf16 %v880_v43, %v879_v41  ;;  %v857_v45 = vmul.f32 %v2511_v37, %v835_v36 }
 0x2ca   : > { %2512 = vrcp.f32 %v838_v42 }
 0x2cb   : > { %2108 = vmatmul.msk.bf16.gmra.mxu0 %vm772_vm0, %v886_v44  ;;  %v865_v53 = vsub.f32 2.0, %v857_v45  ;;  %v2837_v44 = vmov 128.0  }
 0x2cd   : > { %v873_v63 = vmul.f32 %v2511_v37, %v865_v53 }
 0x2cf   : > { %v881_v2 = vmul.f32 %v3086_v1, %v873_v63 }
 0x2d0   : > { %v2513_v54 = vpop.eup %2512 }
 0x2d1   : > { %v858_v55 = vmul.f32 %v2513_v54, %v838_v42  ;;  %v841_v57 = vpop.xlane.xlu2 %840 }
 0x2d2   : > { %2514 = vrcp.f32 %v841_v57 }
 0x2d3   : > { %v866_v51 = vsub.f32 2.0, %v858_v55 }
 0x2d5   : > { %v874_v56 = vmul.f32 %v2513_v54, %v866_v51 }
 0x2d7   : > { %v882_v3 = vmul.f32 %v3090_v6, %v874_v56 }
 0x2d8   : > { %v2515_v4 = vpop.eup %2514 }
 0x2d9   : > { %v844_v5 = vpop.xlane.xlu0 %843  ;;  %v887_v7 = vpack.c.bf16 %v882_v3, %v881_v2  ;;  %v859_v9 = vmul.f32 %v2515_v4, %v841_v57 }
 0x2da   : > { %2516 = vrcp.f32 %v844_v5 }
 0x2db   : > { %2109 = vmatmul.msk.bf16.gmra.mxu0 %vm772_vm0, %v887_v7  ;;  %v867_v10 = vsub.f32 2.0, %v859_v9  ;;  %2518 = vrcp.f32 %v2837_v44 }
 0x2dd   : > { %v875_v15 = vmul.f32 %v2515_v4, %v867_v10 }
 0x2df   : > { %v883_v1 = vmul.f32 %v3094_v11, %v875_v15 }
 0x2e0   : > { %v2517_v12 = vpop.eup %2516 }
 0x2e1   : > { %v860_v13 = vmul.f32 %v2517_v12, %v844_v5 }
 0x2e3   : > { %v868_v16 = vsub.f32 2.0, %v860_v13 }
 0x2e5   : > { %v876_v17 = vmul.f32 %v2517_v12, %v868_v16 }
 0x2e7   : > { %v884_v6 = vmul.f32 %v3098_v14, %v876_v17 }
 0x2e9   : > { %v888_v18 = vpack.c.bf16 %v884_v6, %v883_v1 }
 0x2eb   : > { %2110 = vmatmul.msk.bf16.gmra.mxu0 %vm772_vm0, %v888_v18 }
 0x338   : > { %v934_v22 = vpop.f32.mrf.mxu0 }
 0x340   : > { %v936_v23 = vpop.f32.mrf.mxu0 }
 0x341   : > { %v954_v24 = vpack.c.bf16 %v936_v23, %v934_v22  ;;  %v2332_v22 = vld [vmem:[#allocation11 + $0x74] sm:$0xf0]  ;;  %v2331_v23 = vld [vmem:[#allocation11 + $0x74] sm:$0xf] }
 0x343   : > { %1030 = vmatmul.bf16.vlgmr.msrb.gmra.mxu1 %v954_v24  ;;  %v2202_v24 = vor.u32 %v2332_v22, %v2201_v21 }
 0x345   : > { %1377 = vmatpush.bf16.msra.mxu2 %v2202_v24 }
 0x348   : > { %v939_v25 = vpop.f32.mrf.mxu0 }
 0x350   : > { %v941_v26 = vpop.f32.mrf.mxu0 }
 0x351   : > { %v955_v27 = vpack.c.bf16 %v941_v26, %v939_v25  ;;  %v2203_v25 = vld [vmem:[#allocation11 + $0x78] sm:$0xf0] }
 0x352   : > { %v2206_v26 = vor.u32 %v2331_v23, %v2203_v25 }
 0x353   : > { %1035 = vmatmul.bf16.gmra.mxu1 %v955_v27  ;;  %v2193_v27 = vld [vmem:[#allocation11 + $0x60] sm:$0xf] }
 0x354   : > { %1406 = vmatpush.bf16.msra.mxu3 %v2206_v26 }
 0x358   : > { %v944_v11 = vpop.f32.mrf.mxu0 }
 0x360   : > { %v946_v28 = vpop.f32.mrf.mxu0 }
 0x361   : > { %v956_v14 = vpack.c.bf16 %v946_v28, %v944_v11  ;;  %v2330_v11 = vld [vmem:[#allocation11 + $0x64] sm:$0xf0]  ;;  %v2329_v28 = vld [vmem:[#allocation11 + $0x64] sm:$0xf] }
 0x363   : > { %1040 = vmatmul.bf16.gmra.mxu1 %v956_v14  ;;  %v2194_v14 = vor.u32 %v2330_v11, %v2193_v27 }
 0x365   : > { %1378 = vmatpush.bf16.msra.mxu2 %v2194_v14 }
 0x368   : > { %v949_v29 = vpop.f32.mrf.mxu0 }
 0x370   : > { %v951_v30 = vpop.f32.mrf.mxu0 }
 0x371   : > { %v957_v31 = vpack.c.bf16 %v951_v30, %v949_v29  ;;  %v2195_v29 = vld [vmem:[#allocation11 + $0x68] sm:$0xf0] }
 0x372   : > { %v2198_v30 = vor.u32 %v2329_v28, %v2195_v29 }
 0x373   : > { %1045 = vmatmul.bf16.gmra.mxu1 %v957_v31  ;;  %v2185_v31 = vld [vmem:[#allocation11 + $0x50] sm:$0xf] }
 0x374   : > { %1407 = vmatpush.bf16.msra.mxu3 %v2198_v30 }
 0x3c0   : > { %v1031_v32 = vpop.f32.mrf.mxu1 }
 0x3c1   : > { %v1052_v33 = vadd.f32 %v1031_v32, %v3043_v49  ;;  %v2328_v32 = vld [vmem:[#allocation11 + $0x54] sm:$0xf0] }
 0x3c3   : > { %1060 = vadd.xlane.f32.xlu1 %v1052_v33 }
 0x3c8   : > { %v1033_v34 = vpop.f32.mrf.mxu1 }
 0x3c9   : > { %v1053_v35 = vadd.f32 %v1033_v34, %v3046_v50  ;;  %v2186_v34 = vor.u32 %v2328_v32, %v2185_v31 }
 0x3cb   : > { %1062 = vadd.xlane.f32.xlu2 %v1053_v35  ;;  %1379 = vmatpush.bf16.msra.mxu2 %v2186_v34 }
 0x3d0   : > { %v1036_v36 = vpop.f32.mrf.mxu1 }
 0x3d1   : > { %v1054_v38 = vadd.f32 %v1036_v36, %v3059_v60  ;;  %v2519_v60 = vpop.eup %2518 }
 0x3d2   : > { %v1077_v45 = vmul.f32 128.0, %v2519_v60  ;;  %vm1081_vm1 = vweird.f32 %v2519_v60 }
 0x3d3   : > { %1064 = vadd.xlane.f32.xlu0 %v1054_v38 }
 0x3d4   : > { %v1078_v47 = vsub.f32 1.0, %v1077_v45 }
 0x3d6   : > { %v1079_v52 = vmul.f32 %v2519_v60, %v1078_v47  ;;  %v2161_v47 = vld [vmem:[#allocation11 + $0x20] sm:$0xf] }
 0x3d8   : > { %v1038_v39 = vpop.f32.mrf.mxu1 }
 0x3d9   : > { %v1055_v40 = vadd.f32 %v1038_v39, %v3062_v61  ;;  %v1080_v61 = vadd.f32 %v2519_v60, %v1079_v52  ;;  %v2326_v39 = vld [vmem:[#allocation11 + $0x44] sm:$0xf0] }
 0x3da   : > { %v2322_v52 = vld [vmem:[#allocation11 + $0x24] sm:$0xf0] }
 0x3db   : > { %1066 = vadd.xlane.f32.xlu1 %v1055_v40  ;;  %v3119_v53 = vsel %vm1081_vm1, %v2519_v60, %v1080_v61  ;;  %v2171_v60 = vld [vmem:[#allocation11 + $0x38] sm:$0xf0]  ;;  %v2321_v61 = vld [vmem:[#allocation11 + $0x24] sm:$0xf] }
 0x3e0   : > { %v1041_v41 = vpop.f32.mrf.mxu1 }
 0x3e1   : > { %v1056_v43 = vadd.f32 %v1041_v41, %v3037_v46 }
 0x3e3   : > { %1068 = vadd.xlane.f32.xlu2 %v1056_v43 }
 0x3e8   : > { %v1043_v37 = vpop.f32.mrf.mxu1 }
 0x3e9   : > { %v1057_v49 = vadd.f32 %v1043_v37, %v3040_v48 }
 0x3eb   : > { %1070 = vadd.xlane.f32.xlu0 %v1057_v49 }
 0x3f0   : > { %v1046_v42 = vpop.f32.mrf.mxu1 }
 0x3f1   : > { %v1058_v50 = vadd.f32 %v1046_v42, %v3053_v58  ;;  %v2324_v42 = vld [vmem:[#allocation11 + $0x34] sm:$0xf0] }
 0x3f3   : > { %1072 = vadd.xlane.f32.xlu0 %v1058_v50 }
 0x3f8   : > { %v1048_v62 = vpop.f32.mrf.mxu1 }
 0x3f9   : > { %v3130_v51 = vadd.f32 %v1048_v62, %v3056_v59  ;;  %v2319_v62 = vld [vmem:[#allocation11 + $0x14] sm:$0xf] }
 0x436   : > { %v1061_v46 = vpop.xlane.xlu1 %1060 }
 0x437   : > { %v1083_v54 = vmul.f32 %v3119_v53, %v1061_v46  ;;  %v2162_v46 = vor.u32 %v2322_v52, %v2161_v47 }
 0x439   : > { %v3122_v55 = vsub.f32 %v1052_v33, %v1083_v54  ;;  %v2327_v33 = vld [vmem:[#allocation11 + $0x54] sm:$0xf]  ;;  %v2163_v54 = vld [vmem:[#allocation11 + $0x28] sm:$0xf0] }
 0x43b   : > { %v1099_v48 = vmul.f32 %v3122_v55, %v3122_v55 }
 0x43d   : > { %1107 = vadd.xlane.f32.xlu1 %v1099_v48  ;;  %v2166_v48 = vor.u32 %v2321_v61, %v2163_v54 }
 0x43e   : > { %v1063_v58 = vpop.xlane.xlu2 %1062 }
 0x43f   : > { %v1084_v57 = vmul.f32 %v3119_v53, %v1063_v58  ;;  %v2153_v58 = vld [vmem:[#allocation11 + $0x10] sm:$0xf] }
 0x441   : > { %v3127_v63 = vsub.f32 %v1053_v35, %v1084_v57  ;;  %v2187_v35 = vld [vmem:[#allocation11 + $0x58] sm:$0xf0]  ;;  %v2320_v57 = vld [vmem:[#allocation11 + $0x14] sm:$0xf0] }
 0x442   : > { %v2190_v36 = vor.u32 %v2327_v33, %v2187_v35 }
 0x443   : > { %v1100_v56 = vmul.f32 %v3127_v63, %v3127_v63 }
 0x444   : > { %1408 = vmatpush.bf16.msra.mxu3 %v2190_v36  ;;  %v3172_v36 = vld [vmem:[%s3376_s6] sm:$0xf] }
 0x445   : > { %1109 = vadd.xlane.f32.xlu2 %v1100_v56  ;;  %1074 = vadd.xlane.f32.xlu1 %v3130_v51  ;;  %v2154_v56 = vor.u32 %v2320_v57, %v2153_v58  ;;  %v3182_v47 = vperm.slane %v3172_v36, 1 }
 0x446   : > { %v1065_v0 = vpop.xlane.xlu0 %1064 }
 0x447   : > { %v1085_v2 = vmul.f32 %v3119_v53, %v1065_v0  ;;  %v2155_v0 = vld [vmem:[#allocation11 + $0x18] sm:$0xf0] }
 0x449   : > { %v3136_v3 = vsub.f32 %v1054_v38, %v1085_v2  ;;  %v2177_v38 = vld [vmem:[#allocation11 + $0x40] sm:$0xf]  ;;  %v2158_v2 = vor.u32 %v2319_v62, %v2155_v0 }
 0x44a   : > { %v2178_v41 = vor.u32 %v2326_v39, %v2177_v38 }
 0x44b   : > { %v1101_v4 = vmul.f32 %v3136_v3, %v3136_v3 }
 0x44c   : > { %1380 = vmatpush.bf16.msra.mxu2 %v2178_v41 }
 0x44d   : > { %1111 = vadd.xlane.f32.xlu2 %v1101_v4 }
 0x44e   : > { %v1067_v5 = vpop.xlane.xlu1 %1066 }
 0x44f   : > { %v1086_v7 = vmul.f32 %v3119_v53, %v1067_v5 }
 0x451   : > { %v3141_v59 = vsub.f32 %v1055_v40, %v1086_v7  ;;  %v2325_v40 = vld [vmem:[#allocation11 + $0x44] sm:$0xf]  ;;  %v2145_v7 = vld [vmem:[#allocation11] sm:$0xf] }
 0x453   : > { %v1102_v8 = vmul.f32 %v3141_v59, %v3141_v59 }
 0x455   : > { %1113 = vadd.xlane.f32.xlu0 %v1102_v8  ;;  %v2318_v8 = vld [vmem:[#allocation11 + $0x4] sm:$0xf0] }
 0x456   : > { %v1069_v9 = vpop.xlane.xlu2 %1068 }
 0x457   : > { %v1087_v10 = vmul.f32 %v3119_v53, %v1069_v9  ;;  %v2317_v9 = vld [vmem:[#allocation11 + $0x4] sm:$0xf] }
 0x459   : > { %v3146_v12 = vsub.f32 %v1056_v43, %v1087_v10  ;;  %v2179_v43 = vld [vmem:[#allocation11 + $0x48] sm:$0xf0]  ;;  %v2146_v10 = vor.u32 %v2318_v8, %v2145_v7 }
 0x45a   : > { %v2182_v37 = vor.u32 %v2325_v40, %v2179_v43 }
 0x45b   : > { %v1103_v13 = vmul.f32 %v3146_v12, %v3146_v12 }
 0x45c   : > { %1409 = vmatpush.bf16.msra.mxu3 %v2182_v37  ;;  %v3177_v37 = vperm.slane %v3172_v36, 0 }
 0x45d   : > { %1115 = vadd.xlane.f32.xlu1 %v1103_v13  ;;  %v2147_v13 = vld [vmem:[#allocation11 + $0x8] sm:$0xf0] }
 0x45e   : > { %v1071_v15 = vpop.xlane.xlu0 %1070 }
 0x45f   : > { %v1088_v16 = vmul.f32 %v3119_v53, %v1071_v15 }
 0x461   : > { %v3151_v17 = vsub.f32 %v1057_v49, %v1088_v16  ;;  %v2169_v49 = vld [vmem:[#allocation11 + $0x30] sm:$0xf]  ;;  %v2150_v16 = vor.u32 %v2317_v9, %v2147_v13 }
 0x462   : > { %v2170_v44 = vor.u32 %v2324_v42, %v2169_v49 }
 0x463   : > { %v1104_v1 = vmul.f32 %v3151_v17, %v3151_v17 }
 0x464   : > { %1381 = vmatpush.bf16.msra.mxu2 %v2170_v44 }
 0x465   : > { %1117 = vadd.xlane.f32.xlu2 %v1104_v1 }
 0x466   : > { %v1073_v6 = vpop.xlane.xlu0 %1072 }
 0x467   : > { %v1089_v18 = vmul.f32 %v3119_v53, %v1073_v6 }
 0x468   : > { %1382 = vmatpush.bf16.msra.mxu2 %v2162_v46 }
 0x469   : > { %v3156_v19 = vsub.f32 %v1058_v50, %v1089_v18  ;;  %v2323_v50 = vld [vmem:[#allocation11 + $0x34] sm:$0xf] }
 0x46a   : > { %v2174_v45 = vor.u32 %v2323_v50, %v2171_v60 }
 0x46b   : > { %v1105_v20 = vmul.f32 %v3156_v19, %v3156_v19 }
 0x46c   : > { %1410 = vmatpush.bf16.msra.mxu3 %v2174_v45  ;;  %1383 = vmatpush.bf16.msra.mxu2 %v2154_v56 }
 0x46d   : > { %1119 = vadd.xlane.f32.xlu0 %v1105_v20 }
 0x470   : > { %1411 = vmatpush.bf16.msra.mxu3 %v2166_v48  ;;  %1384 = vmatpush.bf16.msra.mxu2 %v2146_v10 }
 0x474   : > { %1412 = vmatpush.bf16.msra.mxu3 %v2158_v2 }
 0x478   : > { %1413 = vmatpush.bf16.msra.mxu3 %v2150_v16 }
 0x4b0   : > { %v1108_v4 = vpop.xlane.xlu1 %1107 }
 0x4b1   : > { %v1123_v5 = vmul.f32 %v1108_v4, %v3119_v53 }
 0x4b3   : > { %v1131_v15 = vadd.f32 1e-05, %v1123_v5 }
 0x4b5   : > { %2520 = vrsqrt.f32 %v1131_v15  ;;  %vm1145_vm3 = vweird.f32 %v1131_v15 }
 0x4b8   : > { %v1110_v1 = vpop.xlane.xlu2 %1109  ;;  %v1075_v6 = vpop.xlane.xlu1 %1074 }
 0x4b9   : > { %v1124_v18 = vmul.f32 %v1110_v1, %v3119_v53  ;;  %v1090_v20 = vmul.f32 %v3119_v53, %v1075_v6 }
 0x4bb   : > { %v2521_v21 = vpop.eup %2520  ;;  %v1132_v22 = vadd.f32 1e-05, %v1124_v18  ;;  %v3164_v23 = vsub.f32 %v3130_v51, %v1090_v20 }
 0x4bc   : > { %v1140_v24 = vmul.f32 %v2521_v21, %v1131_v15  ;;  %vm1146_vm2 = vweird.f32 %v2521_v21 }
 0x4bd   : > { %2522 = vrsqrt.f32 %v1132_v22  ;;  %v1106_v25 = vmul.f32 %v3164_v23, %v3164_v23  ;;  %vm1147_vm4 = vmor %vm1145_vm3, %vm1146_vm2  ;;  %vm1155_vm6 = vweird.f32 %v1132_v22 }
 0x4be   : > { %v1141_v26 = vmul.f32 %v2521_v21, %v1140_v24 }
 0x4bf   : > { %1121 = vadd.xlane.f32.xlu1 %v1106_v25 }
 0x4c0   : > { %v1142_v27 = vmul.f32 0.5, %v1141_v26  ;;  %v1112_v11 = vpop.xlane.xlu2 %1111 }
 0x4c1   : > { %v1125_v28 = vmul.f32 %v1112_v11, %v3119_v53 }
 0x4c2   : > { %v1143_v14 = vsub.f32 1.5, %v1142_v27 }
 0x4c3   : > { %v2523_v29 = vpop.eup %2522  ;;  %v1133_v30 = vadd.f32 1e-05, %v1125_v28 }
 0x4c4   : > { %v1144_v31 = vmul.f32 %v2521_v21, %v1143_v14  ;;  %v1150_v32 = vmul.f32 %v2523_v29, %v1132_v22  ;;  %vm1156_vm5 = vweird.f32 %v2523_v29 }
 0x4c5   : > { %2524 = vrsqrt.f32 %v1133_v30  ;;  %vm1157_vm7 = vmor %vm1155_vm6, %vm1156_vm5  ;;  %vm1165_vm9 = vweird.f32 %v1133_v30 }
 0x4c6   : > { %v1151_v51 = vmul.f32 %v2523_v29, %v1150_v32  ;;  %v1148_v33 = vsel %vm1147_vm4, %v2521_v21, %v1144_v31 }
 0x4c7   : > { %v1219_v41 = vmul.f32 %v1148_v33, %v3122_v55 }
 0x4c8   : > { %v1152_v34 = vmul.f32 0.5, %v1151_v51  ;;  %v1114_v35 = vpop.xlane.xlu0 %1113 }
 0x4c9   : > { %v1126_v38 = vmul.f32 %v1114_v35, %v3119_v53  ;;  %v1228_v45 = vmul.f32 %v3177_v37, %v1219_v41 }
 0x4ca   : > { %v1153_v39 = vsub.f32 1.5, %v1152_v34 }
 0x4cb   : > { %v2525_v40 = vpop.eup %2524  ;;  %v1134_v43 = vadd.f32 1e-05, %v1126_v38  ;;  %v3187_v57 = vadd.f32 %v3182_v47, %v1228_v45  ;;  %v2338_v45 = vld [vmem:[#allocation12 + $0x28] sm:$0xff] }
 0x4cc   : > { %v1154_v49 = vmul.f32 %v2523_v29, %v1153_v39  ;;  %v1160_v42 = vmul.f32 %v2525_v40, %v1133_v30  ;;  %vm1166_vm8 = vweird.f32 %v2525_v40 }
 0x4cd   : > { %2526 = vrsqrt.f32 %v1134_v43  ;;  %vm1167_vm10 = vmor %vm1165_vm9, %vm1166_vm8  ;;  %vm1175_vm12 = vweird.f32 %v1134_v43 }
 0x4ce   : > { %v1158_v50 = vsel %vm1157_vm7, %v2523_v29, %v1154_v49  ;;  %v1161_v44 = vmul.f32 %v2525_v40, %v1160_v42  ;;  %v2348_v42 = vld [vmem:[#allocation12 + $0x78] sm:$0xff] }
 0x4cf   : > { %v1220_v60 = vmul.f32 %v1158_v50, %v3127_v63  ;;  %1584 = vmatpush.bf16.msra.mxu1 %v2348_v42  ;;  %v2339_v50 = vld [vmem:[#allocation12 + $0x30] sm:$0xff] }
 0x4d0   : > { %v1162_v52 = vmul.f32 0.5, %v1161_v44  ;;  %v1116_v55 = vpop.xlane.xlu1 %1115  ;;  %v2347_v44 = vld [vmem:[#allocation12 + $0x70] sm:$0xff] }
 0x4d1   : > { %v1127_v61 = vmul.f32 %v1116_v55, %v3119_v53  ;;  %v1229_v46 = vmul.f32 %v3177_v37, %v1220_v60 }
 0x4d2   : > { %v1163_v54 = vsub.f32 1.5, %v1162_v52  ;;  %v2346_v52 = vld [vmem:[#allocation12 + $0x68] sm:$0xff] }
 0x4d3   : > { %v2527_v48 = vpop.eup %2526  ;;  %v1135_v58 = vadd.f32 1e-05, %v1127_v61  ;;  %v3190_v62 = vadd.f32 %v3182_v47, %v1229_v46  ;;  %1585 = vmatpush.bf16.msra.mxu1 %v2347_v44  ;;  %v2337_v61 = vld [vmem:[#allocation12 + $0x20] sm:$0xff] }
 0x4d4   : > { %v1164_v63 = vmul.f32 %v2525_v40, %v1163_v54  ;;  %v1170_v56 = vmul.f32 %v2527_v48, %v1134_v43  ;;  %vm1176_vm11 = vweird.f32 %v2527_v48  ;;  %v2345_v46 = vld [vmem:[#allocation12 + $0x60] sm:$0xff] }
 0x4d5   : > { %2528 = vrsqrt.f32 %v1135_v58  ;;  %v1245_v0 = vpack.c.bf16 %v3190_v62, %v3187_v57  ;;  %vm1177_vm13 = vmor %vm1175_vm12, %vm1176_vm11  ;;  %vm1185_vm15 = vweird.f32 %v1135_v58 }
 0x4d6   : > { %v1171_v2 = vmul.f32 %v2527_v48, %v1170_v56  ;;  %v1168_v7 = vsel %vm1167_vm10, %v2525_v40, %v1164_v63  ;;  %v2336_v63 = vld [vmem:[#allocation12 + $0x18] sm:$0xff] }
 0x4d7   : > { %1385 = vmatmul.bf16.vlgmr.msra.gmra.mxu2 %v1245_v0  ;;  %1414 = vmatmul.bf16.vlgmr.msra.gmra.mxu3 %v1245_v0  ;;  %v1221_v15 = vmul.f32 %v1168_v7, %v3136_v3  ;;  %v2344_v56 = vld [vmem:[#allocation12 + $0x58] sm:$0xff]  ;;  %v2343_v7 = vld [vmem:[#allocation12 + $0x50] sm:$0xff] }
 0x4d8   : > { %v1172_v4 = vmul.f32 0.5, %v1171_v2  ;;  %v1118_v5 = vpop.xlane.xlu2 %1117  ;;  %1586 = vmatpush.bf16.msra.mxu1 %v2346_v52 }
 0x4d9   : > { %v1128_v8 = vmul.f32 %v1118_v5, %v3119_v53  ;;  %v1230_v21 = vmul.f32 %v3177_v37, %v1221_v15  ;;  %v2335_v5 = vld [vmem:[#allocation12 + $0x10] sm:$0xff] }
 0x4da   : > { %v1173_v9 = vsub.f32 1.5, %v1172_v4 }
 0x4db   : > { %v2529_v10 = vpop.eup %2528  ;;  %v1136_v13 = vadd.f32 1e-05, %v1128_v8  ;;  %v3200_v27 = vadd.f32 %v3182_v47, %v1230_v21  ;;  %v2334_v8 = vld [vmem:[#allocation12 + $0x8] sm:$0xff] }
 0x4dc   : > { %v1174_v16 = vmul.f32 %v2527_v48, %v1173_v9  ;;  %v1180_v1 = vmul.f32 %v2529_v10, %v1135_v58  ;;  %vm1186_vm14 = vweird.f32 %v2529_v10  ;;  %1587 = vmatpush.bf16.msra.mxu1 %v2345_v46  ;;  %v2342_v9 = vld [vmem:[#allocation12 + $0x48] sm:$0xff] }
 0x4dd   : > { %2530 = vrsqrt.f32 %v1136_v13  ;;  %vm1187_vm0 = vmor %vm1185_vm15, %vm1186_vm14  ;;  %vm1195_vm2 = vweird.f32 %v1136_v13 }
 0x4de   : > { %v1181_v6 = vmul.f32 %v2529_v10, %v1180_v1  ;;  %v1178_v18 = vsel %vm1177_vm13, %v2527_v48, %v1174_v16 }
 0x4df   : > { %v1222_v20 = vmul.f32 %v1178_v18, %v3141_v59  ;;  %v2333_v18 = vld [vmem:[#allocation12] sm:$0xff] }
 0x4e0   : > { %v1182_v22 = vmul.f32 0.5, %v1181_v6  ;;  %1588 = vmatpush.bf16.msra.mxu1 %v2344_v56 }
 0x4e1   : > { %v1231_v24 = vmul.f32 %v3177_v37, %v1222_v20  ;;  %v2341_v20 = vld [vmem:[#allocation12 + $0x40] sm:$0xff] }
 0x4e2   : > { %v1183_v25 = vsub.f32 1.5, %v1182_v22 }
 0x4e3   : > { %v2531_v26 = vpop.eup %2530  ;;  %v3203_v3 = vadd.f32 %v3182_v47, %v1231_v24 }
 0x4e4   : > { %v1184_v11 = vmul.f32 %v2529_v10, %v1183_v25  ;;  %v1190_v28 = vmul.f32 %v2531_v26, %v1136_v13  ;;  %vm1196_vm1 = vweird.f32 %v2531_v26  ;;  %1589 = vmatpush.bf16.msra.mxu1 %v2343_v7 }
 0x4e5   : > { %v1246_v14 = vpack.c.bf16 %v3203_v3, %v3200_v27  ;;  %vm1197_vm3 = vmor %vm1195_vm2, %vm1196_vm1 }
 0x4e6   : > { %v1191_v59 = vmul.f32 %v2531_v26, %v1190_v28  ;;  %v1188_v30 = vsel %vm1187_vm0, %v2529_v10, %v1184_v11 }
 0x4e7   : > { %1390 = vmatmul.bf16.gmra.mxu2 %v1246_v14  ;;  %1419 = vmatmul.bf16.gmra.mxu3 %v1246_v14  ;;  %v1223_v32 = vmul.f32 %v1188_v30, %v3146_v12  ;;  %v1120_v12 = vpop.xlane.xlu0 %1119 }
 0x4e8   : > { %v1192_v29 = vmul.f32 0.5, %v1191_v59  ;;  %v1129_v43 = vmul.f32 %v1120_v12, %v3119_v53  ;;  %1590 = vmatpush.bf16.msra.mxu1 %v2342_v9 }
 0x4e9   : > { %v1232_v35 = vmul.f32 %v3177_v37, %v1223_v32 }
 0x4ea   : > { %v1193_v31 = vsub.f32 1.5, %v1192_v29  ;;  %v1137_v49 = vadd.f32 1e-05, %v1129_v43 }
 0x4eb   : > { %v3212_v39 = vadd.f32 %v3182_v47, %v1232_v35 }
 0x4ec   : > { %v1194_v51 = vmul.f32 %v2531_v26, %v1193_v31  ;;  %2532 = vrsqrt.f32 %v1137_v49  ;;  %vm1205_vm5 = vweird.f32 %v1137_v49  ;;  %1591 = vmatpush.bf16.msra.mxu1 %v2341_v20 }
 0x4ee   : > { %v1198_v33 = vsel %vm1197_vm3, %v2531_v26, %v1194_v51 }
 0x4ef   : > { %v1224_v34 = vmul.f32 %v1198_v33, %v3151_v17  ;;  %v2340_v17 = vld [vmem:[#allocation12 + $0x38] sm:$0xff] }
 0x4f0   : > { %1555 = vmatpush.bf16.msra.mxu0 %v2340_v17 }
 0x4f1   : > { %v1233_v38 = vmul.f32 %v3177_v37, %v1224_v34 }
 0x4f2   : > { %v2533_v60 = vpop.eup %2532 }
 0x4f3   : > { %v3215_v40 = vadd.f32 %v3182_v47, %v1233_v38  ;;  %v1200_v55 = vmul.f32 %v2533_v60, %v1137_v49  ;;  %vm1206_vm4 = vweird.f32 %v2533_v60 }
 0x4f4   : > { %1556 = vmatpush.bf16.msra.mxu0 %v2339_v50  ;;  %vm1207_vm6 = vmor %vm1205_vm5, %vm1206_vm4 }
 0x4f5   : > { %v1247_v41 = vpack.c.bf16 %v3215_v40, %v3212_v39  ;;  %v1201_v54 = vmul.f32 %v2533_v60, %v1200_v55 }
 0x4f7   : > { %1395 = vmatmul.bf16.gmra.mxu2 %v1247_v41  ;;  %1424 = vmatmul.bf16.gmra.mxu3 %v1247_v41  ;;  %v1202_v2 = vmul.f32 0.5, %v1201_v54 }
 0x4f8   : > { %1557 = vmatpush.bf16.msra.mxu0 %v2338_v45 }
 0x4f9   : > { %v1203_v4 = vsub.f32 1.5, %v1202_v2 }
 0x4fb   : > { %v1204_v13 = vmul.f32 %v2533_v60, %v1203_v4 }
 0x4fc   : > { %1558 = vmatpush.bf16.msra.mxu0 %v2337_v61 }
 0x4fd   : > { %v1208_v6 = vsel %vm1207_vm6, %v2533_v60, %v1204_v13 }
 0x4fe   : > { %v1225_v22 = vmul.f32 %v1208_v6, %v3156_v19 }
 0x500   : > { %1559 = vmatpush.bf16.msra.mxu0 %v2336_v63  ;;  %v1234_v11 = vmul.f32 %v3177_v37, %v1225_v22 }
 0x502   : > { %v3226_v14 = vadd.f32 %v3182_v47, %v1234_v11 }
 0x504   : > { %1560 = vmatpush.bf16.msra.mxu0 %v2335_v5 }
 0x508   : > { %1561 = vmatpush.bf16.msra.mxu0 %v2334_v8 }
 0x50c   : > { %1562 = vmatpush.bf16.msra.mxu0 %v2333_v18 }
 0x532   : > { %v1122_v48 = vpop.xlane.xlu1 %1121 }
 0x533   : > { %v1130_v58 = vmul.f32 %v1122_v48, %v3119_v53 }
 0x535   : > { %v1138_v0 = vadd.f32 1e-05, %v1130_v58 }
 0x537   : > { %2534 = vrsqrt.f32 %v1138_v0  ;;  %vm1215_vm8 = vweird.f32 %v1138_v0 }
 0x53d   : > { %v2535_v10 = vpop.eup %2534 }
 0x53e   : > { %v1210_v15 = vmul.f32 %v2535_v10, %v1138_v0  ;;  %vm1216_vm7 = vweird.f32 %v2535_v10 }
 0x53f   : > { %vm1217_vm9 = vmor %vm1215_vm8, %vm1216_vm7 }
 0x540   : > { %v1211_v16 = vmul.f32 %v2535_v10, %v1210_v15 }
 0x542   : > { %v1212_v1 = vmul.f32 0.5, %v1211_v16 }
 0x544   : > { %v1213_v21 = vsub.f32 1.5, %v1212_v1 }
 0x546   : > { %v1214_v24 = vmul.f32 %v2535_v10, %v1213_v21 }
 0x548   : > { %v1218_v25 = vsel %vm1217_vm9, %v2535_v10, %v1214_v24 }
 0x549   : > { %v1226_v26 = vmul.f32 %v1218_v25, %v3164_v23 }
 0x54b   : > { %v1235_v28 = vmul.f32 %v3177_v37, %v1226_v26 }
 0x54d   : > { %v3229_v59 = vadd.f32 %v3182_v47, %v1235_v28 }
 0x54f   : > { %v1248_v29 = vpack.c.bf16 %v3229_v59, %v3226_v14 }
 0x551   : > { %1400 = vmatmul.bf16.gmra.mxu2 %v1248_v29  ;;  %1429 = vmatmul.bf16.gmra.mxu3 %v1248_v29 }
 0x55a   : > { %v1386_v19 = vpop.f32.mrf.mxu2  ;;  %v1415_v30 = vpop.f32.mrf.mxu3 }
 0x55b   : > { %v1435_v23 = vmax.f32 %v1386_v19, 0.0  ;;  %v1436_v51 = vmax.f32 %v1415_v30, 0.0 }
 0x562   : > { %v1388_v31 = vpop.f32.mrf.mxu2  ;;  %v1417_v32 = vpop.f32.mrf.mxu3 }
 0x563   : > { %v1437_v33 = vmax.f32 %v1388_v31, 0.0  ;;  %v1438_v34 = vmax.f32 %v1417_v32, 0.0 }
 0x565   : > { %v1451_v37 = vpack.c.bf16 %v1437_v33, %v1435_v23  ;;  %v1452_v35 = vpack.c.bf16 %v1438_v34, %v1436_v51 }
 0x567   : > { %1563 = vmatmul.bf16.vlgmr.msra.gmra.mxu0 %v1451_v37  ;;  %1592 = vmatmul.bf16.vlgmr.msra.gmra.mxu1 %v1452_v35 }
 0x56a   : > { %v1391_v38 = vpop.f32.mrf.mxu2  ;;  %v1420_v47 = vpop.f32.mrf.mxu3 }
 0x56b   : > { %v1439_v43 = vmax.f32 %v1391_v38, 0.0  ;;  %v1440_v49 = vmax.f32 %v1420_v47, 0.0 }
 0x572   : > { %v1393_v41 = vpop.f32.mrf.mxu2  ;;  %v1422_v12 = vpop.f32.mrf.mxu3 }
 0x573   : > { %v1441_v17 = vmax.f32 %v1393_v41, 0.0  ;;  %v1442_v42 = vmax.f32 %v1422_v12, 0.0 }
 0x575   : > { %v1453_v50 = vpack.c.bf16 %v1441_v17, %v1439_v43  ;;  %v1454_v44 = vpack.c.bf16 %v1442_v42, %v1440_v49 }
 0x577   : > { %1568 = vmatmul.bf16.gmra.mxu0 %v1453_v50  ;;  %1597 = vmatmul.bf16.gmra.mxu1 %v1454_v44 }
 0x57a   : > { %v1396_v60 = vpop.f32.mrf.mxu2  ;;  %v1425_v45 = vpop.f32.mrf.mxu3 }
 0x57b   : > { %v1443_v61 = vmax.f32 %v1396_v60, 0.0  ;;  %v1444_v46 = vmax.f32 %v1425_v45, 0.0 }
 0x582   : > { %v1398_v52 = vpop.f32.mrf.mxu2  ;;  %v1427_v55 = vpop.f32.mrf.mxu3 }
 0x583   : > { %v1445_v54 = vmax.f32 %v1398_v52, 0.0  ;;  %v1446_v48 = vmax.f32 %v1427_v55, 0.0 }
 0x585   : > { %v1455_v58 = vpack.c.bf16 %v1445_v54, %v1443_v61  ;;  %v1456_v63 = vpack.c.bf16 %v1446_v48, %v1444_v46 }
 0x587   : > { %1573 = vmatmul.bf16.gmra.mxu0 %v1455_v58  ;;  %1602 = vmatmul.bf16.gmra.mxu1 %v1456_v63 }
 0x5d4   : > { %v1401_v56 = vpop.f32.mrf.mxu2  ;;  %v1430_v0 = vpop.f32.mrf.mxu3 }
 0x5d5   : > { %v1447_v5 = vmax.f32 %v1401_v56, 0.0  ;;  %v1448_v7 = vmax.f32 %v1430_v0, 0.0 }
 0x5dc   : > { %v1403_v2 = vpop.f32.mrf.mxu2  ;;  %v1432_v4 = vpop.f32.mrf.mxu3 }
 0x5dd   : > { %v1449_v8 = vmax.f32 %v1403_v2, 0.0  ;;  %v1450_v9 = vmax.f32 %v1432_v4, 0.0 }
 0x5df   : > { %v1457_v10 = vpack.c.bf16 %v1449_v8, %v1447_v5  ;;  %v1458_v13 = vpack.c.bf16 %v1450_v9, %v1448_v7 }
 0x5e1   : > { %1578 = vmatmul.bf16.gmra.mxu0 %v1457_v10  ;;  %1607 = vmatmul.bf16.gmra.mxu1 %v1458_v13 }
 0x5e4   : > { %v1564_v15 = vpop.f32.mrf.mxu0  ;;  %v1593_v16 = vpop.f32.mrf.mxu1 }
 0x5e5   : > { %v1594_v1 = vadd.f32 %v1593_v16, %v1564_v15 }
 0x5e7   : > { %v1613_v6 = vadd.f32 %v1594_v1, %v3187_v57 }
 0x5e9   : > { %1621 = vadd.xlane.f32.xlu2 %v1613_v6 }
 0x5ec   : > { %v1566_v18 = vpop.f32.mrf.mxu0  ;;  %v1595_v20 = vpop.f32.mrf.mxu1 }
 0x5ed   : > { %v1596_v21 = vadd.f32 %v1595_v20, %v1566_v18 }
 0x5ef   : > { %v1614_v22 = vadd.f32 %v1596_v21, %v3190_v62 }
 0x5f1   : > { %1623 = vadd.xlane.f32.xlu0 %v1614_v22 }
 0x5f4   : > { %v1569_v24 = vpop.f32.mrf.mxu0  ;;  %v1598_v25 = vpop.f32.mrf.mxu1 }
 0x5f5   : > { %v1599_v26 = vadd.f32 %v1598_v25, %v1569_v24 }
 0x5f7   : > { %v1615_v11 = vadd.f32 %v1599_v26, %v3200_v27 }
 0x5f9   : > { %1625 = vadd.xlane.f32.xlu1 %v1615_v11 }
 0x5fc   : > { %v1571_v28 = vpop.f32.mrf.mxu0  ;;  %v1600_v29 = vpop.f32.mrf.mxu1 }
 0x5fd   : > { %v1601_v19 = vadd.f32 %v1600_v29, %v1571_v28 }
 0x5ff   : > { %v1616_v30 = vadd.f32 %v1601_v19, %v3203_v3 }
 0x601   : > { %1627 = vadd.xlane.f32.xlu2 %v1616_v30 }
 0x604   : > { %v1574_v57 = vpop.f32.mrf.mxu0  ;;  %v1603_v31 = vpop.f32.mrf.mxu1 }
 0x605   : > { %v1604_v32 = vadd.f32 %v1603_v31, %v1574_v57 }
 0x607   : > { %v1617_v23 = vadd.f32 %v1604_v32, %v3212_v39 }
 0x609   : > { %1629 = vadd.xlane.f32.xlu0 %v1617_v23 }
 0x60c   : > { %v1576_v62 = vpop.f32.mrf.mxu0  ;;  %v1605_v51 = vpop.f32.mrf.mxu1 }
 0x60d   : > { %v1606_v33 = vadd.f32 %v1605_v51, %v1576_v62 }
 0x60f   : > { %v1618_v34 = vadd.f32 %v1606_v33, %v3215_v40  ;;  %v3288_v33 = vperm.slane %v3172_v36, 3 }
 0x611   : > { %1631 = vadd.xlane.f32.xlu1 %v1618_v34 }
 0x65c   : > { %v1622_v27 = vpop.xlane.xlu2 %1621 }
 0x65d   : > { %v1637_v37 = vmul.f32 %v1622_v27, %v3119_v53 }
 0x65e   : > { %v1579_v35 = vpop.f32.mrf.mxu0  ;;  %v1608_v38 = vpop.f32.mrf.mxu1 }
 0x65f   : > { %v3240_v47 = vsub.f32 %v1613_v6, %v1637_v37  ;;  %v1609_v3 = vadd.f32 %v1608_v38, %v1579_v35 }
 0x661   : > { %v1653_v41 = vmul.f32 %v3240_v47, %v3240_v47  ;;  %v1619_v39 = vadd.f32 %v1609_v3, %v3226_v14 }
 0x663   : > { %1661 = vadd.xlane.f32.xlu1 %v1653_v41  ;;  %1633 = vadd.xlane.f32.xlu2 %v1619_v39 }
 0x664   : > { %v1624_v12 = vpop.xlane.xlu0 %1623 }
 0x665   : > { %v1638_v43 = vmul.f32 %v1624_v12, %v3119_v53 }
 0x666   : > { %v1581_v40 = vpop.f32.mrf.mxu0  ;;  %v1610_v49 = vpop.f32.mrf.mxu1 }
 0x667   : > { %v3246_v17 = vsub.f32 %v1614_v22, %v1638_v43  ;;  %v1611_v42 = vadd.f32 %v1610_v49, %v1581_v40 }
 0x669   : > { %v1654_v50 = vmul.f32 %v3246_v17, %v3246_v17  ;;  %v1620_v44 = vadd.f32 %v1611_v42, %v3229_v59 }
 0x66b   : > { %1663 = vadd.xlane.f32.xlu2 %v1654_v50  ;;  %1635 = vadd.xlane.f32.xlu0 %v1620_v44 }
 0x66c   : > { %v1626_v60 = vpop.xlane.xlu1 %1625 }
 0x66d   : > { %v1639_v14 = vmul.f32 %v1626_v60, %v3119_v53 }
 0x66f   : > { %v3252_v45 = vsub.f32 %v1615_v11, %v1639_v14 }
 0x671   : > { %v1655_v52 = vmul.f32 %v3252_v45, %v3252_v45 }
 0x673   : > { %1665 = vadd.xlane.f32.xlu0 %v1655_v52 }
 0x674   : > { %v1628_v55 = vpop.xlane.xlu2 %1627 }
 0x675   : > { %v1640_v61 = vmul.f32 %v1628_v55, %v3119_v53 }
 0x677   : > { %v3257_v46 = vsub.f32 %v1616_v30, %v1640_v61 }
 0x679   : > { %v1656_v54 = vmul.f32 %v3257_v46, %v3257_v46 }
 0x67b   : > { %1667 = vadd.xlane.f32.xlu1 %v1656_v54 }
 0x67c   : > { %v1630_v59 = vpop.xlane.xlu0 %1629 }
 0x67d   : > { %v1641_v48 = vmul.f32 %v1630_v59, %v3119_v53 }
 0x67f   : > { %v3262_v58 = vsub.f32 %v1617_v23, %v1641_v48  ;;  %v3285_v23 = vperm.slane %v3172_v36, 2 }
 0x681   : > { %v1657_v63 = vmul.f32 %v3262_v58, %v3262_v58 }
 0x683   : > { %1669 = vadd.xlane.f32.xlu2 %v1657_v63 }
 0x684   : > { %v1632_v56 = vpop.xlane.xlu1 %1631 }
 0x685   : > { %v1642_v0 = vmul.f32 %v1632_v56, %v3119_v53 }
 0x687   : > { %v3267_v2 = vsub.f32 %v1618_v34, %v1642_v0 }
 0x689   : > { %v1658_v4 = vmul.f32 %v3267_v2, %v3267_v2 }
 0x68b   : > { %1671 = vadd.xlane.f32.xlu0 %v1658_v4 }
 0x6d6   : > { %v1634_v5 = vpop.xlane.xlu2 %1633  ;;  %v1662_v7 = vpop.xlane.xlu1 %1661 }
 0x6d7   : > { %v1643_v8 = vmul.f32 %v1634_v5, %v3119_v53  ;;  %v1677_v9 = vmul.f32 %v1662_v7, %v3119_v53 }
 0x6d9   : > { %v3273_v10 = vsub.f32 %v1619_v39, %v1643_v8  ;;  %v1685_v13 = vadd.f32 1e-05, %v1677_v9 }
 0x6db   : > { %2536 = vrsqrt.f32 %v1685_v13  ;;  %v1659_v15 = vmul.f32 %v3273_v10, %v3273_v10  ;;  %vm1699_vm11 = vweird.f32 %v1685_v13 }
 0x6dd   : > { %1673 = vadd.xlane.f32.xlu1 %v1659_v15 }
 0x6de   : > { %v1664_v16 = vpop.xlane.xlu2 %1663  ;;  %v1636_v1 = vpop.xlane.xlu0 %1635 }
 0x6df   : > { %v1678_v6 = vmul.f32 %v1664_v16, %v3119_v53  ;;  %v1644_v18 = vmul.f32 %v1636_v1, %v3119_v53 }
 0x6e1   : > { %v2537_v20 = vpop.eup %2536  ;;  %v1686_v21 = vadd.f32 1e-05, %v1678_v6  ;;  %v3279_v22 = vsub.f32 %v1620_v44, %v1644_v18 }
 0x6e2   : > { %v1694_v24 = vmul.f32 %v2537_v20, %v1685_v13  ;;  %vm1700_vm10 = vweird.f32 %v2537_v20 }
 0x6e3   : > { %2538 = vrsqrt.f32 %v1686_v21  ;;  %v1660_v25 = vmul.f32 %v3279_v22, %v3279_v22  ;;  %vm1701_vm12 = vmor %vm1699_vm11, %vm1700_vm10  ;;  %vm1709_vm14 = vweird.f32 %v1686_v21 }
 0x6e4   : > { %v1695_v26 = vmul.f32 %v2537_v20, %v1694_v24 }
 0x6e5   : > { %1675 = vadd.xlane.f32.xlu2 %v1660_v25 }
 0x6e6   : > { %v1696_v11 = vmul.f32 0.5, %v1695_v26  ;;  %v1666_v28 = vpop.xlane.xlu0 %1665 }
 0x6e7   : > { %v1679_v29 = vmul.f32 %v1666_v28, %v3119_v53 }
 0x6e8   : > { %v1697_v19 = vsub.f32 1.5, %v1696_v11 }
 0x6e9   : > { %v2539_v30 = vpop.eup %2538  ;;  %v1687_v57 = vadd.f32 1e-05, %v1679_v29 }
 0x6ea   : > { %v1698_v31 = vmul.f32 %v2537_v20, %v1697_v19  ;;  %v1704_v32 = vmul.f32 %v2539_v30, %v1686_v21  ;;  %vm1710_vm13 = vweird.f32 %v2539_v30 }
 0x6eb   : > { %2540 = vrsqrt.f32 %v1687_v57  ;;  %vm1711_vm15 = vmor %vm1709_vm14, %vm1710_vm13  ;;  %vm1719_vm1 = vweird.f32 %v1687_v57 }
 0x6ec   : > { %v1702_v62 = vsel %vm1701_vm12, %v2537_v20, %v1698_v31  ;;  %v1705_v51 = vmul.f32 %v2539_v30, %v1704_v32 }
 0x6ed   : > { %v1773_v34 = vmul.f32 %v1702_v62, %v3240_v47 }
 0x6ee   : > { %v1706_v27 = vmul.f32 0.5, %v1705_v51  ;;  %v1668_v37 = vpop.xlane.xlu1 %1667 }
 0x6ef   : > { %v1782_v35 = vmul.f32 %v3285_v23, %v1773_v34  ;;  %v1680_v38 = vmul.f32 %v1668_v37, %v3119_v53 }
 0x6f0   : > { %v1707_v3 = vsub.f32 1.5, %v1706_v27 }
 0x6f1   : > { %v2541_v41 = vpop.eup %2540  ;;  %v1791_v39 = vadd.f32 %v3288_v33, %v1782_v35  ;;  %v1688_v12 = vadd.f32 1e-05, %v1680_v38 }
 0x6f2   : > { %v1708_v43 = vmul.f32 %v2539_v30, %v1707_v3  ;;  %v1714_v40 = vmul.f32 %v2541_v41, %v1687_v57  ;;  %vm1720_vm0 = vweird.f32 %v2541_v41 }
 0x6f3   : > { %1799 = vst [vmem:[%s3296_s3] sm:$0xff] %v1791_v39  ;;  %2542 = vrsqrt.f32 %v1688_v12  ;;  %vm1721_vm2 = vmor %vm1719_vm1, %vm1720_vm0  ;;  %vm1729_vm4 = vweird.f32 %v1688_v12 }
 0x6f4   : > { %v1712_v36 = vsel %vm1711_vm15, %v2539_v30, %v1708_v43  ;;  %v1715_v47 = vmul.f32 %v2541_v41, %v1714_v40 }
 0x6f5   : > { %v1774_v49 = vmul.f32 %v1712_v36, %v3246_v17 }
 0x6f6   : > { %v1716_v42 = vmul.f32 0.5, %v1715_v47  ;;  %v1670_v50 = vpop.xlane.xlu2 %1669 }
 0x6f7   : > { %v1783_v44 = vmul.f32 %v3285_v23, %v1774_v49  ;;  %v1681_v60 = vmul.f32 %v1670_v50, %v3119_v53 }
 0x6f8   : > { %v1717_v14 = vsub.f32 1.5, %v1716_v42 }
 0x6f9   : > { %v2543_v52 = vpop.eup %2542  ;;  %v1792_v55 = vadd.f32 %v3288_v33, %v1783_v44  ;;  %v1689_v61 = vadd.f32 1e-05, %v1681_v60 }
 0x6fa   : > { %v1718_v54 = vmul.f32 %v2541_v41, %v1717_v14  ;;  %v1724_v59 = vmul.f32 %v2543_v52, %v1688_v12  ;;  %vm1730_vm3 = vweird.f32 %v2543_v52 }
 0x6fb   : > { %1800 = vst [vmem:[%s3296_s3 + $0x8] sm:$0xff] %v1792_v55  ;;  %2544 = vrsqrt.f32 %v1689_v61  ;;  %vm1731_vm5 = vmor %vm1729_vm4, %vm1730_vm3  ;;  %vm1739_vm7 = vweird.f32 %v1689_v61 }
 0x6fc   : > { %v1722_v17 = vsel %vm1721_vm2, %v2541_v41, %v1718_v54  ;;  %v1725_v48 = vmul.f32 %v2543_v52, %v1724_v59 }
 0x6fd   : > { %v1775_v63 = vmul.f32 %v1722_v17, %v3252_v45 }
 0x6fe   : > { %v1726_v56 = vmul.f32 0.5, %v1725_v48  ;;  %v1672_v0 = vpop.xlane.xlu0 %1671 }
 0x6ff   : > { %v1784_v4 = vmul.f32 %v3285_v23, %v1775_v63  ;;  %v1682_v5 = vmul.f32 %v1672_v0, %v3119_v53 }
 0x700   : > { %v1727_v7 = vsub.f32 1.5, %v1726_v56 }
 0x701   : > { %v2545_v8 = vpop.eup %2544  ;;  %v1793_v9 = vadd.f32 %v3288_v33, %v1784_v4  ;;  %v1690_v13 = vadd.f32 1e-05, %v1682_v5 }
 0x702   : > { %v1728_v15 = vmul.f32 %v2543_v52, %v1727_v7  ;;  %v1734_v16 = vmul.f32 %v2545_v8, %v1689_v61  ;;  %vm1740_vm6 = vweird.f32 %v2545_v8 }
 0x703   : > { %1801 = vst [vmem:[%s3296_s3 + $0x10] sm:$0xff] %v1793_v9  ;;  %2546 = vrsqrt.f32 %v1690_v13  ;;  %vm1741_vm8 = vmor %vm1739_vm7, %vm1740_vm6  ;;  %vm1749_vm10 = vweird.f32 %v1690_v13 }
 0x704   : > { %v1732_v45 = vsel %vm1731_vm5, %v2543_v52, %v1728_v15  ;;  %v1735_v1 = vmul.f32 %v2545_v8, %v1734_v16 }
 0x705   : > { %v1776_v6 = vmul.f32 %v1732_v45, %v3257_v46 }
 0x706   : > { %v1736_v18 = vmul.f32 0.5, %v1735_v1 }
 0x707   : > { %v1785_v20 = vmul.f32 %v3285_v23, %v1776_v6 }
 0x708   : > { %v1737_v21 = vsub.f32 1.5, %v1736_v18 }
 0x709   : > { %v2547_v24 = vpop.eup %2546  ;;  %v1794_v25 = vadd.f32 %v3288_v33, %v1785_v20 }
 0x70a   : > { %v1738_v26 = vmul.f32 %v2545_v8, %v1737_v21  ;;  %v1744_v11 = vmul.f32 %v2547_v24, %v1690_v13  ;;  %vm1750_vm9 = vweird.f32 %v2547_v24 }
 0x70b   : > { %1802 = vst [vmem:[%s3296_s3 + $0x18] sm:$0xff] %v1794_v25  ;;  %vm1751_vm11 = vmor %vm1749_vm10, %vm1750_vm9 }
 0x70c   : > { %v1742_v28 = vsel %vm1741_vm8, %v2545_v8, %v1738_v26  ;;  %v1745_v29 = vmul.f32 %v2547_v24, %v1744_v11 }
 0x70d   : > { %v1777_v19 = vmul.f32 %v1742_v28, %v3262_v58 }
 0x70e   : > { %v1746_v46 = vmul.f32 0.5, %v1745_v29 }
 0x70f   : > { %v1786_v30 = vmul.f32 %v3285_v23, %v1777_v19 }
 0x710   : > { %v1747_v57 = vsub.f32 1.5, %v1746_v46 }
 0x711   : > { %v1795_v31 = vadd.f32 %v3288_v33, %v1786_v30 }
 0x712   : > { %v1748_v32 = vmul.f32 %v2547_v24, %v1747_v57 }
 0x713   : > { %1803 = vst [vmem:[%s3296_s3 + $0x20] sm:$0xff] %v1795_v31 }
 0x714   : > { %v1752_v62 = vsel %vm1751_vm11, %v2547_v24, %v1748_v32 }
 0x715   : > { %v1778_v51 = vmul.f32 %v1752_v62, %v3267_v2 }
 0x717   : > { %v1787_v34 = vmul.f32 %v3285_v23, %v1778_v51 }
 0x719   : > { %v1796_v27 = vadd.f32 %v3288_v33, %v1787_v34 }
 0x71b   : > { %1804 = vst [vmem:[%s3296_s3 + $0x28] sm:$0xff] %v1796_v27 }
 0x750   : > { %v1674_v58 = vpop.xlane.xlu1 %1673 }
 0x751   : > { %v1683_v37 = vmul.f32 %v1674_v58, %v3119_v53 }
 0x753   : > { %v1691_v35 = vadd.f32 1e-05, %v1683_v37 }
 0x755   : > { %2548 = vrsqrt.f32 %v1691_v35  ;;  %vm1759_vm13 = vweird.f32 %v1691_v35 }
 0x758   : > { %v1676_v38 = vpop.xlane.xlu2 %1675 }
 0x759   : > { %v1684_v3 = vmul.f32 %v1676_v38, %v3119_v53 }
 0x75b   : > { %v2549_v41 = vpop.eup %2548  ;;  %v1692_v39 = vadd.f32 1e-05, %v1684_v3 }
 0x75c   : > { %v1754_v12 = vmul.f32 %v2549_v41, %v1691_v35  ;;  %vm1760_vm12 = vweird.f32 %v2549_v41 }
 0x75d   : > { %2550 = vrsqrt.f32 %v1692_v39  ;;  %vm1761_vm14 = vmor %vm1759_vm13, %vm1760_vm12  ;;  %vm1769_vm0 = vweird.f32 %v1692_v39 }
 0x75e   : > { %v1755_v43 = vmul.f32 %v2549_v41, %v1754_v12 }
 0x760   : > { %v1756_v2 = vmul.f32 0.5, %v1755_v43 }
 0x762   : > { %v1757_v40 = vsub.f32 1.5, %v1756_v2 }
 0x763   : > { %v2551_v36 = vpop.eup %2550 }
 0x764   : > { %v1758_v47 = vmul.f32 %v2549_v41, %v1757_v40  ;;  %v1764_v49 = vmul.f32 %v2551_v36, %v1692_v39  ;;  %vm1770_vm15 = vweird.f32 %v2551_v36 }
 0x765   : > { %vm1771_vm1 = vmor %vm1769_vm0, %vm1770_vm15 }
 0x766   : > { %v1762_v42 = vsel %vm1761_vm14, %v2549_v41, %v1758_v47  ;;  %v1765_v50 = vmul.f32 %v2551_v36, %v1764_v49 }
 0x767   : > { %v1779_v53 = vmul.f32 %v1762_v42, %v3273_v10 }
 0x768   : > { %v1766_v44 = vmul.f32 0.5, %v1765_v50 }
 0x769   : > { %v1788_v60 = vmul.f32 %v3285_v23, %v1779_v53 }
 0x76a   : > { %v1767_v14 = vsub.f32 1.5, %v1766_v44 }
 0x76b   : > { %v1797_v52 = vadd.f32 %v3288_v33, %v1788_v60 }
 0x76c   : > { %v1768_v55 = vmul.f32 %v2551_v36, %v1767_v14 }
 0x76d   : > { %1805 = vst [vmem:[%s3296_s3 + $0x30] sm:$0xff] %v1797_v52 }
 0x76e   : > { %v1772_v10 = vsel %vm1771_vm1, %v2551_v36, %v1768_v55 }
 0x76f   : > { %v1780_v61 = vmul.f32 %v1772_v10, %v3279_v22 }
 0x771   : > { %v1789_v54 = vmul.f32 %v3285_v23, %v1780_v61 }
 0x773   : > { %v1798_v59 = vadd.f32 %v3288_v33, %v1789_v54 }
 0x775   : > { %1806 = vst [vmem:[%s3296_s3 + $0x38] sm:$0xff] %v1798_v59 }
 0x776   : > { %2759 = shalt.err (!%p2756_p13)
}
 0x777   : > { %s2838_s4 = smov 128   ;;  %s2839_s1 = smov 8  }
 0x778   : > { %2388 = dma.vmem_to_hbm [thread:$0]  (%p2987_p4), %s1823_s10, 1024, %s1825_s27, %s1808_s13, %s2838_s4, %s2838_s4, %s2839_s1  }
 0x779 PF: > { %s1839_s2 = sand.u32 1, %s2806_s24   ;;  %p2411_p0 = pnand %p1967_p6, %p2995_p7 }
 0x77a   : > { %s1840_s3 = scalar_lea.sflag [#allocation5], %s1839_s2 }
 0x77b   : > { %p2412_p2 = pneg %p2411_p0 }
 0x77d   : > { %2801 = dma.done.wait (%p2412_p2), %s1840_s3, 1024  }
 0x77e   : > { %2803 = vsyncadd (%p2412_p2), %s1840_s3, 4294966272  ;;  %s26_s29 = sadd.s32 1, %s2826_s29   ;;  %s3399_s24 = smov %s2810_s25 }
 0x77f   : > { %p23_p5 = scmp.ge.s32.totalorder %s26_s29, 4   ;;  %s3400_s25 = smov %s2814_s26 }
 0x780   : > { %s3401_s26 = smov %s2993_s30  ;;  %s3402_s27 = smov %s2822_s28 }
 0x781   : > { %s3403_s28 = smov %s3405_s17  ;;  %25 = sbr.rel (!%p23_p5) target bundleno = 14 (0xe), region = 118 }
 0x786   :  { %1846 = vsyncpa [#allocation4], 1 }
 0x787   :  { %1848 = vsyncpa [#allocation4 + $0x1], 1 }
 0x788   :  { %1849 = vsyncpa [#allocation7], 1 }
 0x789   :  { %1850 = vsyncpa [#allocation10], 1 }
 0x78a   :  { %1851 = vsyncpa [#allocation13], 1 }
 0x78b   :  { %1852 = vsyncpa [#allocation5], 1 }
 0x78c   :  { %1854 = vsyncpa [#allocation5 + $0x1], 1 }

</bundles_post_ra>
